<compile_context>
chip_gen: v7x
topology: tpu7x:2x2x1
jax: 0.10.0
libtpu: 0.0.40
codegen_flags: <defaults>
</compile_context>

<pallas_src>
import functools

import jax
import jax.numpy as jnp
from jax.experimental import pallas as pl
from jax.experimental.pallas import tpu as pltpu


def _round_up(x, m):
    return ((x + m - 1) // m) * m


def _bf16_elemwise_supported():
    """bf16 EUP/VPU paths exist on v6e/v7x; v5e (and older) would emulate."""
    try:
        kind = jax.devices()[0].device_kind.lower()
    except Exception:
        return False
    return ("v6" in kind) or ("v7" in kind)


def generator_kernel(mean_ref, std_ref, w_ref, b_ref, noise_ref,
                     adv_ref, part_ref, *, target, n_valid, tn,
                     use_bf16_elemwise):
    """One (tn, D) row block of Generator.forward.

    mean_ref           : (1, D)    f32  learnable mean (resident)
    std_ref            : (1, D)    f32  softplus(var), precomputed (resident)
    w_ref              : (D, CP)   bf16 synthetic classifier weights (resident)
    b_ref              : (1, CP)   f32  classifier bias, -1e30 on padded cols
    noise_ref          : (tn, D)   bf16 standard-normal noise row block
    adv_ref            : (tn, D)   bf16 out: tanh(mean + noise * adv_std)
    part_ref           : (1,8,128) f32  out: per-block partial sums
                         lane 0: sum(0.5*noise^2)        over valid rows
                         lane 1: sum(log(1-adv^2+1e-8))  over valid rows
                         lane 2: sum(lse - tgt_logit)    over valid rows
    """
    i = pl.program_id(0)

    mean = mean_ref[...]                                   # (1, D) f32
    adv_std = std_ref[...]                                 # (1, D) f32
    noise = noise_ref[...].astype(jnp.float32)             # (tn, D) f32

    arg = mean + noise * adv_std                           # (tn, D) f32
    if use_bf16_elemwise:
        adv_bf = jnp.tanh(arg.astype(jnp.bfloat16))        # bf16 EUP tanh
        adv_ref[...] = adv_bf
        adv = adv_bf.astype(jnp.float32)
    else:
        adv = jnp.tanh(arg)                                # f32 tanh (v5e-safe)
        adv_ref[...] = adv.astype(adv_ref.dtype)

    # Valid-row mask (padded rows only exist in the last block); applied AFTER
    # the D reduction so it is a (tn,1) multiply, not a (tn,D) one.
    row = jax.lax.broadcasted_iota(jnp.int32, (tn, 1), 0) + i * tn
    valid = (row < n_valid).astype(jnp.float32)            # (tn, 1)

    noise_row = jnp.sum(0.5 * noise * noise, axis=-1, keepdims=True)  # (tn,1)
    one_m = 1.0 - adv * adv + 1e-8                         # f32 argument
    if use_bf16_elemwise:
        log_term = jnp.log(one_m.astype(jnp.bfloat16)).astype(jnp.float32)
    else:
        log_term = jnp.log(one_m)
    logadv_row = jnp.sum(log_term, axis=-1, keepdims=True)            # (tn,1)

    s_noise = jnp.sum(valid * noise_row)
    s_logadv = jnp.sum(valid * logadv_row)

    # Synthetic linear classifier on the MXU: bf16 inputs, f32 accumulation.
    # Padded class columns carry a -1e30 bias (baked in by the wrapper), so no
    # in-kernel column mask is needed; exp underflows cleanly in f32.
    logits = jnp.dot(adv.astype(jnp.bfloat16), w_ref[...],
                     preferred_element_type=jnp.float32) + b_ref[...]  # (tn,CP)
    m = jnp.max(logits, axis=-1, keepdims=True)
    lse = m + jnp.log(jnp.sum(jnp.exp(logits - m), axis=-1, keepdims=True))
    tgt = logits[:, target:target + 1]                     # (tn, 1)
    s_ce = jnp.sum(valid * (lse - tgt))

    sub = jax.lax.broadcasted_iota(jnp.int32, (1, 8, 128), 1)
    lane = jax.lax.broadcasted_iota(jnp.int32, (1, 8, 128), 2)
    first = sub == 0
    payload = jnp.where(first & (lane == 0), s_noise,
              jnp.where(first & (lane == 1), s_logadv,
              jnp.where(first & (lane == 2), s_ce, 0.0)))
    part_ref[...] = payload.astype(jnp.float32)


def generator_forward(mean, var, noise, w, b, *, target, lam, num_classes,
                      use_bf16_elemwise=None):
    """mean/var: (C,H,W); noise: (N,C,H,W); w: (D, CP); b: (CP,)."""
    n = noise.shape[0]
    d = int(mean.size)
    cp = int(w.shape[1])
    assert 0 <= int(target) < int(num_classes) <= cp
    assert d % 128 == 0, "flattened feature dim must be lane-aligned"

    if use_bf16_elemwise is None:
        use_bf16_elemwise = _bf16_elemwise_supported()

    # Hoisted out of the kernel (perf review): softplus(var) and the (1, D)
    # entropy term are computed once in plain XLA.
    adv_std2 = jax.nn.softplus(var.reshape(1, d).astype(jnp.float32))
    s_std = jnp.sum(jnp.log(adv_std2 + 1e-8))             # scalar
    mean2 = mean.reshape(1, d).astype(jnp.float32)

    # VMEM budget: ~80% of the queried capacity (leave Mosaic headroom).
    try:
        vmem_cap = int(pltpu.get_tpu_info().vmem_capacity_bytes)
    except Exception:
        vmem_cap = 64 * 1024 * 1024                        # v7x per-core floor
    vmem_budget = int(0.8 * vmem_cap)

    def working_set(tn_):
        resident = d * cp * 2 + 2 * d * 4 + cp * 4         # w + mean/std + bias
        pipelined = 2 * 2 * (tn_ * d * 2)                  # noise+adv, 2-buffered
        temps = 6 * tn_ * d * 4                            # f32 elementwise tmps
        return resident + pipelined + temps

    # Row tile: full bf16 sublane groups, capped at 512 rows (perf review),
    # shrunk if the per-block working set would exceed the VMEM budget.
    tn = min(512, _round_up(max(n, 1), 16))
    while tn > 16 and working_set(tn) > vmem_budget:
        tn = max(16, (tn // 32) * 16)
    n_pad = _round_up(n, tn)
    nb = n_pad // tn

    noise2 = jnp.pad(noise.reshape(n, d).astype(jnp.bfloat16),
                     ((0, n_pad - n), (0, 0)))
    w2 = w.astype(jnp.bfloat16)
    # Bake the num_classes mask into the bias (perf review): padded class
    # columns get -1e30 so the in-kernel iota+select disappears.
    col = jnp.arange(cp)
    b2 = jnp.where(col < int(num_classes), b.astype(jnp.float32),
                   jnp.float32(-1e30)).reshape(1, cp)

    kernel = functools.partial(generator_kernel, target=int(target),
                               n_valid=int(n), tn=int(tn),
                               use_bf16_elemwise=bool(use_bf16_elemwise))
    # TODO(synk): if target varies at runtime, move it to scalar-prefetch SMEM
    # (PrefetchScalarGridSpec) to avoid a Mosaic recompile per target value.

    cost = pl.CostEstimate(
        flops=int(2 * n_pad * d * cp + 10 * n_pad * d),
        transcendentals=int(2 * n_pad * d + n_pad * cp),
        bytes_accessed=int(2 * n_pad * d * 2 + d * cp * 2 + 2 * d * 4
                           + cp * 4 + nb * 8 * 128 * 4),
    )

    vmem_limit = min(vmem_budget, max(32 * 1024 * 1024, 2 * working_set(tn)))

    def build(resident_mode):
        def rspec(shape, imap):
            if resident_mode is None:
                return pl.BlockSpec(shape, imap)
            return pl.BlockSpec(shape, imap, pipeline_mode=resident_mode)
        return pl.pallas_call(
            kernel,
            out_shape=(jax.ShapeDtypeStruct((n_pad, d), jnp.bfloat16),
                       jax.ShapeDtypeStruct((nb, 8, 128), jnp.float32)),
            grid=(nb,),
            in_specs=[
                rspec((1, d), lambda i: (0, 0)),            # mean   (resident)
                rspec((1, d), lambda i: (0, 0)),            # adv_std(resident)
                rspec((d, cp), lambda i: (0, 0)),           # w      (resident)
                rspec((1, cp), lambda i: (0, 0)),           # bias   (resident)
                pl.BlockSpec((tn, d), lambda i: (i, 0)),    # noise row block
            ],
            out_specs=(
                pl.BlockSpec((tn, d), lambda i: (i, 0)),    # adv row block
                pl.BlockSpec((1, 8, 128), lambda i: (i, 0, 0)),  # partial sums
            ),
            compiler_params=pltpu.CompilerParams(
                dimension_semantics=("parallel",),
                vmem_limit_bytes=int(vmem_limit)),
            cost_estimate=cost,
        )

    args = (mean2, adv_std2, w2, b2, noise2)
    try:
        # Resident inputs single-buffered (perf review): constant index_map
        # already skips re-DMA; this halves their VMEM footprint.
        adv_flat, partials = build(pl.Buffered(1))(*args)
        jax.block_until_ready((adv_flat, partials))
    except Exception:
        # Fallback: default double-buffering if Buffered(1) is unsupported.
        adv_flat, partials = build(None)(*args)

    # Final scalar combine (cheap; keeps the row grid embarrassingly parallel).
    s_noise = jnp.sum(partials[:, 0, 0])
    s_logadv = jnp.sum(partials[:, 0, 1])
    s_ce = jnp.sum(partials[:, 0, 2])

    entropy = (s_noise + s_logadv) / float(n * d) + s_std / float(d)
    ce = s_ce / float(n)
    loss = -ce + lam * entropy

    adv = adv_flat[:n].reshape(noise.shape)
    return adv, loss


def generator_forward_ref(mean, var, noise, w, b, *, target, lam, num_classes,
                          use_bf16_elemwise=False):
    """Pure-JAX reference of the same math (mimics kernel precision choices)."""
    adv_std = jax.nn.softplus(var.astype(jnp.float32))
    noise_f = noise.astype(jnp.float32)
    arg = mean.astype(jnp.float32) + noise_f * adv_std
    if use_bf16_elemwise:
        adv = jnp.tanh(arg.astype(jnp.bfloat16)).astype(jnp.float32)
        log1 = jnp.log((1.0 - adv ** 2 + 1e-8).astype(jnp.bfloat16)
                       ).astype(jnp.float32)
    else:
        adv = jnp.tanh(arg)
        log1 = jnp.log(1.0 - adv ** 2 + 1e-8)
    nlp = 0.5 * noise_f ** 2 + jnp.log(adv_std + 1e-8) + log1
    entropy = jnp.mean(nlp)
    n = noise.shape[0]
    logits = jnp.dot(adv.reshape(n, -1).astype(jnp.bfloat16),
                     w.astype(jnp.bfloat16),
                     preferred_element_type=jnp.float32) + b.astype(jnp.float32)
    logits = logits[:, :num_classes]
    lse = jax.scipy.special.logsumexp(logits, axis=-1)
    ce = jnp.mean(lse - logits[:, target])
    return adv, -ce + lam * entropy


if __name__ == "__main__":
    # Shapes implied by the module: noise_structure = (B, C, H, W); params use [1:].
    C, H, W = 4, 16, 16
    noise_size = 2            # phoni_size / batch of generated samples
    num_classes = 10
    target = 3
    lam = 0.01
    D = C * H * W
    CP = 128                  # classes zero-padded to one full lane group

    key = jax.random.PRNGKey(0)
    k_noise, k_w, k_b = jax.random.split(key, 3)

    # Module __init__: mean = var = zeros(noise_structure[1:])
    mean = jnp.zeros((C, H, W), jnp.float32)
    var = jnp.zeros((C, H, W), jnp.float32)

    # rand_noise ~ N(0,1) with shape (noise_size, C, H, W)  (glue: sampled in JAX)
    noise_f32 = jax.random.normal(k_noise, (noise_size, C, H, W), jnp.float32)
    # The kernel does bf16 I/O; use the same bf16-rounded noise for the reference.
    noise = noise_f32.astype(jnp.bfloat16).astype(jnp.float32)

    # Deterministic synthetic linear classifier (stands in for `cla`).
    w_real = 0.02 * jax.random.normal(k_w, (D, num_classes), jnp.float32)
    b_real = 0.02 * jax.random.normal(k_b, (num_classes,), jnp.float32)
    w_pad = jnp.zeros((D, CP), jnp.float32).at[:, :num_classes].set(w_real)
    b_pad = jnp.zeros((CP,), jnp.float32).at[:num_classes].set(b_real)

    use_bf16 = _bf16_elemwise_supported()

    adv, loss = generator_forward(mean, var, noise, w_pad, b_pad,
                                  target=target, lam=lam,
                                  num_classes=num_classes,
                                  use_bf16_elemwise=use_bf16)
    adv = jax.block_until_ready(adv)
    loss = jax.block_until_ready(loss)

    adv_ref, loss_ref = generator_forward_ref(mean, var, noise, w_pad, b_pad,
                                              target=target, lam=lam,
                                              num_classes=num_classes,
                                              use_bf16_elemwise=use_bf16)
    assert adv.shape == (noise_size, C, H, W)
    # adv output is bf16 (HBM-traffic optimization) -> bf16-level tolerance.
    assert jnp.allclose(adv.astype(jnp.float32), adv_ref, atol=1e-2, rtol=1e-2)
    assert jnp.allclose(loss, loss_ref, atol=1e-2, rtol=1e-2)

    print("KERNEL_OK")
</pallas_src>

<mosaic_0001>
module attributes {stable_mosaic.version = 11 : i64} {
  func.func @generator_kernel(%arg0: i32, %arg1: memref<1x1024xf32, #tpu.memory_space<vmem>>, %arg2: memref<1x1024xf32, #tpu.memory_space<vmem>>, %arg3: memref<1024x128xbf16, #tpu.memory_space<vmem>>, %arg4: memref<1x128xf32, #tpu.memory_space<vmem>>, %arg5: memref<16x1024xbf16, #tpu.memory_space<vmem>>, %arg6: memref<16x1024xbf16, #tpu.memory_space<vmem>>, %arg7: memref<1x8x128xf32, #tpu.memory_space<vmem>>) attributes {dimension_semantics = [#tpu.dimension_semantics<parallel>], iteration_bounds = array<i64: 1>, scalar_prefetch = 0 : i64, scratch_operands = 0 : i64, tpu.core_type = #tpu.core_type<tc>, window_params = [{pipeline_mode = #tpu.pipeline_mode<synchronous>, transform_indices = @transform_0, window_bounds = array<i64: 1, 1024>}, {pipeline_mode = #tpu.pipeline_mode<synchronous>, transform_indices = @transform_1, window_bounds = array<i64: 1, 1024>}, {pipeline_mode = #tpu.pipeline_mode<synchronous>, transform_indices = @transform_2, window_bounds = array<i64: 1024, 128>}, {pipeline_mode = #tpu.pipeline_mode<synchronous>, transform_indices = @transform_3, window_bounds = array<i64: 1, 128>}, {transform_indices = @transform_4, window_bounds = array<i64: 16, 1024>}, {transform_indices = @transform_5, window_bounds = array<i64: 16, 1024>}, {transform_indices = @transform_6, window_bounds = array<i64: 1, 8, 128>}]} {
    %c0 = arith.constant 0 : index
    %c0_0 = arith.constant 0 : index
    %0 = vector.load %arg1[%c0, %c0_0] : memref<1x1024xf32, #tpu.memory_space<vmem>>, vector<1x1024xf32>
    %c0_1 = arith.constant 0 : index
    %c0_2 = arith.constant 0 : index
    %1 = vector.load %arg2[%c0_1, %c0_2] : memref<1x1024xf32, #tpu.memory_space<vmem>>, vector<1x1024xf32>
    %c0_3 = arith.constant 0 : index
    %c0_4 = arith.constant 0 : index
    %2 = vector.load %arg5[%c0_3, %c0_4] : memref<16x1024xbf16, #tpu.memory_space<vmem>>, vector<16x1024xbf16>
    %3 = arith.extf %2 : vector<16x1024xbf16> to vector<16x1024xf32>
    %4 = vector.broadcast %1 : vector<1x1024xf32> to vector<16x1024xf32>
    %5 = arith.mulf %3, %4 : vector<16x1024xf32>
    %6 = vector.broadcast %0 : vector<1x1024xf32> to vector<16x1024xf32>
    %7 = arith.addf %6, %5 : vector<16x1024xf32>
    %8 = math.tanh %7 : vector<16x1024xf32>
    %9 = arith.truncf %8 : vector<16x1024xf32> to vector<16x1024xbf16>
    %c0_5 = arith.constant 0 : index
    %c0_6 = arith.constant 0 : index
    %10 = vector.load %arg6[%c0_5, %c0_6] : memref<16x1024xbf16, #tpu.memory_space<vmem>>, vector<16x1024xbf16>
    tpu.vector_store %arg6[%c0_5, %c0_6], %9 {strides = array<i32>} : memref<16x1024xbf16, #tpu.memory_space<vmem>>, vector<16x1024xbf16>,
    %11 = tpu.iota {dimensions = array<i32: 0>} : vector<16x1xi32>
    %c16_i32 = arith.constant 16 : i32
    %12 = arith.muli %arg0, %c16_i32 : i32
    %13 = vector.broadcast %12 : i32 to vector<16x1xi32>
    %14 = arith.addi %11, %13 : vector<16x1xi32>
    %c2_i32 = arith.constant 2 : i32
    %15 = vector.broadcast %c2_i32 : i32 to vector<16x1xi32>
    %16 = arith.cmpi slt, %14, %15 : vector<16x1xi32>
    %17 = arith.extui %16 : vector<16x1xi1> to vector<16x1xi32>
    %18 = arith.sitofp %17 : vector<16x1xi32> to vector<16x1xf32>
    %cst = arith.constant 5.000000e-01 : f32
    %19 = vector.broadcast %cst : f32 to vector<16x1024xf32>
    %20 = arith.mulf %19, %3 : vector<16x1024xf32>
    %21 = arith.mulf %20, %3 : vector<16x1024xf32>
    %cst_7 = arith.constant dense<0.000000e+00> : vector<16xf32>
    %22 = vector.multi_reduction <add>, %21, %cst_7 [1] : vector<16x1024xf32> to vector<16xf32>
    %23 = vector.shape_cast %22 : vector<16xf32> to vector<16x1xf32>
    %24 = arith.mulf %8, %8 : vector<16x1024xf32>
    %cst_8 = arith.constant 1.000000e+00 : f32
    %25 = vector.broadcast %cst_8 : f32 to vector<16x1024xf32>
    %26 = arith.subf %25, %24 : vector<16x1024xf32>
    %cst_9 = arith.constant 9.99999993E-9 : f32
    %27 = vector.broadcast %cst_9 : f32 to vector<16x1024xf32>
    %28 = arith.addf %26, %27 : vector<16x1024xf32>
    %29 = math.log %28 : vector<16x1024xf32>
    %cst_10 = arith.constant dense<0.000000e+00> : vector<16xf32>
    %30 = vector.multi_reduction <add>, %29, %cst_10 [1] : vector<16x1024xf32> to vector<16xf32>
    %31 = vector.shape_cast %30 : vector<16xf32> to vector<16x1xf32>
    %32 = arith.mulf %18, %23 : vector<16x1xf32>
    %33 = vector.shape_cast %32 : vector<16x1xf32> to vector<1x16x1xf32>
    %cst_11 = arith.constant dense<0.000000e+00> : vector<1xf32>
    %34 = vector.multi_reduction <add>, %33, %cst_11 [1, 2] : vector<1x16x1xf32> to vector<1xf32>
    %35 = vector.shape_cast %34 : vector<1xf32> to vector<1x1x1xf32>
    %36 = vector.extract %35[0, 0, 0] : f32 from vector<1x1x1xf32>
    %37 = arith.mulf %18, %31 : vector<16x1xf32>
    %38 = vector.shape_cast %37 : vector<16x1xf32> to vector<1x16x1xf32>
    %cst_12 = arith.constant dense<0.000000e+00> : vector<1xf32>
    %39 = vector.multi_reduction <add>, %38, %cst_12 [1, 2] : vector<1x16x1xf32> to vector<1xf32>
    %40 = vector.shape_cast %39 : vector<1xf32> to vector<1x1x1xf32>
    %41 = vector.extract %40[0, 0, 0] : f32 from vector<1x1x1xf32>
    %42 = arith.truncf %8 : vector<16x1024xf32> to vector<16x1024xbf16>
    %c0_13 = arith.constant 0 : index
    %c0_14 = arith.constant 0 : index
    %43 = vector.load %arg3[%c0_13, %c0_14] : memref<1024x128xbf16, #tpu.memory_space<vmem>>, vector<1024x128xbf16>
    %cst_15 = arith.constant dense<0.000000e+00> : vector<16x128xf32>
    %44 = tpu.matmul %42, %43, %cst_15 {dimension_numbers = #tpu.dot_dimension_numbers<[1], [0], [0], [1], [0, 0, 1, 1], [], []>} : vector<16x1024xbf16>, vector<1024x128xbf16>, vector<16x128xf32> -> vector<16x128xf32>
    %c0_16 = arith.constant 0 : index
    %c0_17 = arith.constant 0 : index
    %45 = vector.load %arg4[%c0_16, %c0_17] : memref<1x128xf32, #tpu.memory_space<vmem>>, vector<1x128xf32>
    %46 = vector.broadcast %45 : vector<1x128xf32> to vector<16x128xf32>
    %47 = arith.addf %44, %46 : vector<16x128xf32>
    %cst_18 = arith.constant dense<0xFF800000> : vector<16xf32>
    %48 = vector.multi_reduction <maximumf>, %47, %cst_18 [1] : vector<16x128xf32> to vector<16xf32>
    %49 = vector.shape_cast %48 : vector<16xf32> to vector<16x1xf32>
    %50 = vector.broadcast %49 : vector<16x1xf32> to vector<16x128xf32>
    %51 = arith.subf %47, %50 : vector<16x128xf32>
    %52 = math.exp %51 : vector<16x128xf32>
    %cst_19 = arith.constant dense<0.000000e+00> : vector<16xf32>
    %53 = vector.multi_reduction <add>, %52, %cst_19 [1] : vector<16x128xf32> to vector<16xf32>
    %54 = vector.shape_cast %53 : vector<16xf32> to vector<16x1xf32>
    %55 = math.log %54 : vector<16x1xf32>
    %56 = arith.addf %49, %55 : vector<16x1xf32>
    %57 = vector.extract_strided_slice %47 {offsets = [0, 3], sizes = [16, 1], strides = [1, 1]} : vector<16x128xf32> to vector<16x1xf32>
    %58 = arith.subf %56, %57 : vector<16x1xf32>
    %59 = arith.mulf %18, %58 : vector<16x1xf32>
    %60 = vector.shape_cast %59 : vector<16x1xf32> to vector<1x16x1xf32>
    %cst_20 = arith.constant dense<0.000000e+00> : vector<1xf32>
    %61 = vector.multi_reduction <add>, %60, %cst_20 [1, 2] : vector<1x16x1xf32> to vector<1xf32>
    %62 = vector.shape_cast %61 : vector<1xf32> to vector<1x1x1xf32>
    %63 = vector.extract %62[0, 0, 0] : f32 from vector<1x1x1xf32>
    %64 = tpu.iota {dimensions = array<i32: 1>} : vector<1x8x128xi32>
    %65 = tpu.iota {dimensions = array<i32: 2>} : vector<1x8x128xi32>
    %c0_i32 = arith.constant 0 : i32
    %66 = vector.broadcast %c0_i32 : i32 to vector<1x8x128xi32>
    %67 = arith.cmpi eq, %64, %66 : vector<1x8x128xi32>
    %c0_i32_21 = arith.constant 0 : i32
    %68 = vector.broadcast %c0_i32_21 : i32 to vector<1x8x128xi32>
    %69 = arith.cmpi eq, %65, %68 : vector<1x8x128xi32>
    %70 = arith.andi %67, %69 : vector<1x8x128xi1>
    %c1_i32 = arith.constant 1 : i32
    %71 = vector.broadcast %c1_i32 : i32 to vector<1x8x128xi32>
    %72 = arith.cmpi eq, %65, %71 : vector<1x8x128xi32>
    %73 = arith.andi %67, %72 : vector<1x8x128xi1>
    %c2_i32_22 = arith.constant 2 : i32
    %74 = vector.broadcast %c2_i32_22 : i32 to vector<1x8x128xi32>
    %75 = arith.cmpi eq, %65, %74 : vector<1x8x128xi32>
    %76 = arith.andi %67, %75 : vector<1x8x128xi1>
    %cst_23 = arith.constant 0.000000e+00 : f32
    %77 = vector.broadcast %63 : f32 to vector<1x8x128xf32>
    %78 = vector.broadcast %cst_23 : f32 to vector<1x8x128xf32>
    %79 = arith.select %76, %77, %78 : vector<1x8x128xi1>, vector<1x8x128xf32>
    %80 = vector.broadcast %41 : f32 to vector<1x8x128xf32>
    %81 = arith.select %73, %80, %79 : vector<1x8x128xi1>, vector<1x8x128xf32>
    %82 = vector.broadcast %36 : f32 to vector<1x8x128xf32>
    %83 = arith.select %70, %82, %81 : vector<1x8x128xi1>, vector<1x8x128xf32>
    %c0_24 = arith.constant 0 : index
    %c0_25 = arith.constant 0 : index
    %c0_26 = arith.constant 0 : index
    %84 = vector.load %arg7[%c0_24, %c0_25, %c0_26] : memref<1x8x128xf32, #tpu.memory_space<vmem>>, vector<1x8x128xf32>
    tpu.vector_store %arg7[%c0_24, %c0_25, %c0_26], %83 {strides = array<i32>} : memref<1x8x128xf32, #tpu.memory_space<vmem>>, vector<1x8x128xf32>,
    return
  }
  func.func @transform_0(%arg0: i32) -> (i32, i32) {
    %c0_i32 = arith.constant 0 : i32
    %c0_i32_0 = arith.constant 0 : i32
    %c0_i32_1 = arith.constant 0 : i32
    return %c0_i32, %c0_i32_0 : i32, i32
  }
  func.func @transform_1(%arg0: i32) -> (i32, i32) {
    %c0_i32 = arith.constant 0 : i32
    %c0_i32_0 = arith.constant 0 : i32
    %c0_i32_1 = arith.constant 0 : i32
    return %c0_i32, %c0_i32_0 : i32, i32
  }
  func.func @transform_2(%arg0: i32) -> (i32, i32) {
    %c0_i32 = arith.constant 0 : i32
    %c0_i32_0 = arith.constant 0 : i32
    %c0_i32_1 = arith.constant 0 : i32
    return %c0_i32, %c0_i32_0 : i32, i32
  }
  func.func @transform_3(%arg0: i32) -> (i32, i32) {
    %c0_i32 = arith.constant 0 : i32
    %c0_i32_0 = arith.constant 0 : i32
    %c0_i32_1 = arith.constant 0 : i32
    return %c0_i32, %c0_i32_0 : i32, i32
  }
  func.func @transform_4(%arg0: i32) -> (i32, i32) {
    %c0_i32 = arith.constant 0 : i32
    %c0_i32_0 = arith.constant 0 : i32
    return %arg0, %c0_i32 : i32, i32
  }
  func.func @transform_5(%arg0: i32) -> (i32, i32) {
    %c0_i32 = arith.constant 0 : i32
    %c0_i32_0 = arith.constant 0 : i32
    return %arg0, %c0_i32 : i32, i32
  }
  func.func @transform_6(%arg0: i32) -> (i32, i32, i32) {
    %c0_i32 = arith.constant 0 : i32
    %c0_i32_0 = arith.constant 0 : i32
    %c0_i32_1 = arith.constant 0 : i32
    return %arg0, %c0_i32, %c0_i32_0 : i32, i32, i32
  }
}

module attributes {stable_mosaic.version = 11 : i64} {
  func.func @generator_kernel(%arg0: i32, %arg1: memref<1x1024xf32, #tpu.memory_space<vmem>>, %arg2: memref<1x1024xf32, #tpu.memory_space<vmem>>, %arg3: memref<1024x128xbf16, #tpu.memory_space<vmem>>, %arg4: memref<1x128xf32, #tpu.memory_space<vmem>>, %arg5: memref<16x1024xbf16, #tpu.memory_space<vmem>>, %arg6: memref<16x1024xbf16, #tpu.memory_space<vmem>>, %arg7: memref<1x8x128xf32, #tpu.memory_space<vmem>>) attributes {dimension_semantics = [#tpu.dimension_semantics<parallel>], iteration_bounds = array<i64: 1>, scalar_prefetch = 0 : i64, scratch_operands = 0 : i64, tpu.core_type = #tpu.core_type<tc>, window_params = [{pipeline_mode = #tpu.pipeline_mode<synchronous>, transform_indices = @transform_0, window_bounds = array<i64: 1, 1024>}, {pipeline_mode = #tpu.pipeline_mode<synchronous>, transform_indices = @transform_1, window_bounds = array<i64: 1, 1024>}, {pipeline_mode = #tpu.pipeline_mode<synchronous>, transform_indices = @transform_2, window_bounds = array<i64: 1024, 128>}, {pipeline_mode = #tpu.pipeline_mode<synchronous>, transform_indices = @transform_3, window_bounds = array<i64: 1, 128>}, {transform_indices = @transform_4, window_bounds = array<i64: 16, 1024>}, {transform_indices = @transform_5, window_bounds = array<i64: 16, 1024>}, {transform_indices = @transform_6, window_bounds = array<i64: 1, 8, 128>}]} {
    %c0 = arith.constant 0 : index
    %c0_0 = arith.constant 0 : index
    %0 = vector.load %arg1[%c0, %c0_0] : memref<1x1024xf32, #tpu.memory_space<vmem>>, vector<1x1024xf32>
    %c0_1 = arith.constant 0 : index
    %c0_2 = arith.constant 0 : index
    %1 = vector.load %arg2[%c0_1, %c0_2] : memref<1x1024xf32, #tpu.memory_space<vmem>>, vector<1x1024xf32>
    %c0_3 = arith.constant 0 : index
    %c0_4 = arith.constant 0 : index
    %2 = vector.load %arg5[%c0_3, %c0_4] : memref<16x1024xbf16, #tpu.memory_space<vmem>>, vector<16x1024xbf16>
    %3 = arith.extf %2 : vector<16x1024xbf16> to vector<16x1024xf32>
    %4 = vector.broadcast %1 : vector<1x1024xf32> to vector<16x1024xf32>
    %5 = arith.mulf %3, %4 : vector<16x1024xf32>
    %6 = vector.broadcast %0 : vector<1x1024xf32> to vector<16x1024xf32>
    %7 = arith.addf %6, %5 : vector<16x1024xf32>
    %8 = math.tanh %7 : vector<16x1024xf32>
    %9 = arith.truncf %8 : vector<16x1024xf32> to vector<16x1024xbf16>
    %c0_5 = arith.constant 0 : index
    %c0_6 = arith.constant 0 : index
    %10 = vector.load %arg6[%c0_5, %c0_6] : memref<16x1024xbf16, #tpu.memory_space<vmem>>, vector<16x1024xbf16>
    tpu.vector_store %arg6[%c0_5, %c0_6], %9 {strides = array<i32>} : memref<16x1024xbf16, #tpu.memory_space<vmem>>, vector<16x1024xbf16>,
    %11 = tpu.iota {dimensions = array<i32: 0>} : vector<16x1xi32>
    %c16_i32 = arith.constant 16 : i32
    %12 = arith.muli %arg0, %c16_i32 : i32
    %13 = vector.broadcast %12 : i32 to vector<16x1xi32>
    %14 = arith.addi %11, %13 : vector<16x1xi32>
    %c2_i32 = arith.constant 2 : i32
    %15 = vector.broadcast %c2_i32 : i32 to vector<16x1xi32>
    %16 = arith.cmpi slt, %14, %15 : vector<16x1xi32>
    %17 = arith.extui %16 : vector<16x1xi1> to vector<16x1xi32>
    %18 = arith.sitofp %17 : vector<16x1xi32> to vector<16x1xf32>
    %cst = arith.constant 5.000000e-01 : f32
    %19 = vector.broadcast %cst : f32 to vector<16x1024xf32>
    %20 = arith.mulf %19, %3 : vector<16x1024xf32>
    %21 = arith.mulf %20, %3 : vector<16x1024xf32>
    %cst_7 = arith.constant dense<0.000000e+00> : vector<16xf32>
    %22 = vector.multi_reduction <add>, %21, %cst_7 [1] : vector<16x1024xf32> to vector<16xf32>
    %23 = vector.shape_cast %22 : vector<16xf32> to vector<16x1xf32>
    %24 = arith.mulf %8, %8 : vector<16x1024xf32>
    %cst_8 = arith.constant 1.000000e+00 : f32
    %25 = vector.broadcast %cst_8 : f32 to vector<16x1024xf32>
    %26 = arith.subf %25, %24 : vector<16x1024xf32>
    %cst_9 = arith.constant 9.99999993E-9 : f32
    %27 = vector.broadcast %cst_9 : f32 to vector<16x1024xf32>
    %28 = arith.addf %26, %27 : vector<16x1024xf32>
    %29 = math.log %28 : vector<16x1024xf32>
    %cst_10 = arith.constant dense<0.000000e+00> : vector<16xf32>
    %30 = vector.multi_reduction <add>, %29, %cst_10 [1] : vector<16x1024xf32> to vector<16xf32>
    %31 = vector.shape_cast %30 : vector<16xf32> to vector<16x1xf32>
    %32 = arith.mulf %18, %23 : vector<16x1xf32>
    %33 = vector.shape_cast %32 : vector<16x1xf32> to vector<1x16x1xf32>
    %cst_11 = arith.constant dense<0.000000e+00> : vector<1xf32>
    %34 = vector.multi_reduction <add>, %33, %cst_11 [1, 2] : vector<1x16x1xf32> to vector<1xf32>
    %35 = vector.shape_cast %34 : vector<1xf32> to vector<1x1x1xf32>
    %36 = vector.extract %35[0, 0, 0] : f32 from vector<1x1x1xf32>
    %37 = arith.mulf %18, %31 : vector<16x1xf32>
    %38 = vector.shape_cast %37 : vector<16x1xf32> to vector<1x16x1xf32>
    %cst_12 = arith.constant dense<0.000000e+00> : vector<1xf32>
    %39 = vector.multi_reduction <add>, %38, %cst_12 [1, 2] : vector<1x16x1xf32> to vector<1xf32>
    %40 = vector.shape_cast %39 : vector<1xf32> to vector<1x1x1xf32>
    %41 = vector.extract %40[0, 0, 0] : f32 from vector<1x1x1xf32>
    %42 = arith.truncf %8 : vector<16x1024xf32> to vector<16x1024xbf16>
    %c0_13 = arith.constant 0 : index
    %c0_14 = arith.constant 0 : index
    %43 = vector.load %arg3[%c0_13, %c0_14] : memref<1024x128xbf16, #tpu.memory_space<vmem>>, vector<1024x128xbf16>
    %cst_15 = arith.constant dense<0.000000e+00> : vector<16x128xf32>
    %44 = tpu.matmul %42, %43, %cst_15 {dimension_numbers = #tpu.dot_dimension_numbers<[1], [0], [0], [1], [0, 0, 1, 1], [], []>} : vector<16x1024xbf16>, vector<1024x128xbf16>, vector<16x128xf32> -> vector<16x128xf32>
    %c0_16 = arith.constant 0 : index
    %c0_17 = arith.constant 0 : index
    %45 = vector.load %arg4[%c0_16, %c0_17] : memref<1x128xf32, #tpu.memory_space<vmem>>, vector<1x128xf32>
    %46 = vector.broadcast %45 : vector<1x128xf32> to vector<16x128xf32>
    %47 = arith.addf %44, %46 : vector<16x128xf32>
    %cst_18 = arith.constant dense<0xFF800000> : vector<16xf32>
    %48 = vector.multi_reduction <maximumf>, %47, %cst_18 [1] : vector<16x128xf32> to vector<16xf32>
    %49 = vector.shape_cast %48 : vector<16xf32> to vector<16x1xf32>
    %50 = vector.broadcast %49 : vector<16x1xf32> to vector<16x128xf32>
    %51 = arith.subf %47, %50 : vector<16x128xf32>
    %52 = math.exp %51 : vector<16x128xf32>
    %cst_19 = arith.constant dense<0.000000e+00> : vector<16xf32>
    %53 = vector.multi_reduction <add>, %52, %cst_19 [1] : vector<16x128xf32> to vector<16xf32>
    %54 = vector.shape_cast %53 : vector<16xf32> to vector<16x1xf32>
    %55 = math.log %54 : vector<16x1xf32>
    %56 = arith.addf %49, %55 : vector<16x1xf32>
    %57 = vector.extract_strided_slice %47 {offsets = [0, 3], sizes = [16, 1], strides = [1, 1]} : vector<16x128xf32> to vector<16x1xf32>
    %58 = arith.subf %56, %57 : vector<16x1xf32>
    %59 = arith.mulf %18, %58 : vector<16x1xf32>
    %60 = vector.shape_cast %59 : vector<16x1xf32> to vector<1x16x1xf32>
    %cst_20 = arith.constant dense<0.000000e+00> : vector<1xf32>
    %61 = vector.multi_reduction <add>, %60, %cst_20 [1, 2] : vector<1x16x1xf32> to vector<1xf32>
    %62 = vector.shape_cast %61 : vector<1xf32> to vector<1x1x1xf32>
    %63 = vector.extract %62[0, 0, 0] : f32 from vector<1x1x1xf32>
    %64 = tpu.iota {dimensions = array<i32: 1>} : vector<1x8x128xi32>
    %65 = tpu.iota {dimensions = array<i32: 2>} : vector<1x8x128xi32>
    %c0_i32 = arith.constant 0 : i32
    %66 = vector.broadcast %c0_i32 : i32 to vector<1x8x128xi32>
    %67 = arith.cmpi eq, %64, %66 : vector<1x8x128xi32>
    %c0_i32_21 = arith.constant 0 : i32
    %68 = vector.broadcast %c0_i32_21 : i32 to vector<1x8x128xi32>
    %69 = arith.cmpi eq, %65, %68 : vector<1x8x128xi32>
    %70 = arith.andi %67, %69 : vector<1x8x128xi1>
    %c1_i32 = arith.constant 1 : i32
    %71 = vector.broadcast %c1_i32 : i32 to vector<1x8x128xi32>
    %72 = arith.cmpi eq, %65, %71 : vector<1x8x128xi32>
    %73 = arith.andi %67, %72 : vector<1x8x128xi1>
    %c2_i32_22 = arith.constant 2 : i32
    %74 = vector.broadcast %c2_i32_22 : i32 to vector<1x8x128xi32>
    %75 = arith.cmpi eq, %65, %74 : vector<1x8x128xi32>
    %76 = arith.andi %67, %75 : vector<1x8x128xi1>
    %cst_23 = arith.constant 0.000000e+00 : f32
    %77 = vector.broadcast %63 : f32 to vector<1x8x128xf32>
    %78 = vector.broadcast %cst_23 : f32 to vector<1x8x128xf32>
    %79 = arith.select %76, %77, %78 : vector<1x8x128xi1>, vector<1x8x128xf32>
    %80 = vector.broadcast %41 : f32 to vector<1x8x128xf32>
    %81 = arith.select %73, %80, %79 : vector<1x8x128xi1>, vector<1x8x128xf32>
    %82 = vector.broadcast %36 : f32 to vector<1x8x128xf32>
    %83 = arith.select %70, %82, %81 : vector<1x8x128xi1>, vector<1x8x128xf32>
    %c0_24 = arith.constant 0 : index
    %c0_25 = arith.constant 0 : index
    %c0_26 = arith.constant 0 : index
    %84 = vector.load %arg7[%c0_24, %c0_25, %c0_26] : memref<1x8x128xf32, #tpu.memory_space<vmem>>, vector<1x8x128xf32>
    tpu.vector_store %arg7[%c0_24, %c0_25, %c0_26], %83 {strides = array<i32>} : memref<1x8x128xf32, #tpu.memory_space<vmem>>, vector<1x8x128xf32>,
    return
  }
  func.func @transform_0(%arg0: i32) -> (i32, i32) {
    %c0_i32 = arith.constant 0 : i32
    %c0_i32_0 = arith.constant 0 : i32
    %c0_i32_1 = arith.constant 0 : i32
    return %c0_i32, %c0_i32_0 : i32, i32
  }
  func.func @transform_1(%arg0: i32) -> (i32, i32) {
    %c0_i32 = arith.constant 0 : i32
    %c0_i32_0 = arith.constant 0 : i32
    %c0_i32_1 = arith.constant 0 : i32
    return %c0_i32, %c0_i32_0 : i32, i32
  }
  func.func @transform_2(%arg0: i32) -> (i32, i32) {
    %c0_i32 = arith.constant 0 : i32
    %c0_i32_0 = arith.constant 0 : i32
    %c0_i32_1 = arith.constant 0 : i32
    return %c0_i32, %c0_i32_0 : i32, i32
  }
  func.func @transform_3(%arg0: i32) -> (i32, i32) {
    %c0_i32 = arith.constant 0 : i32
    %c0_i32_0 = arith.constant 0 : i32
    %c0_i32_1 = arith.constant 0 : i32
    return %c0_i32, %c0_i32_0 : i32, i32
  }
  func.func @transform_4(%arg0: i32) -> (i32, i32) {
    %c0_i32 = arith.constant 0 : i32
    %c0_i32_0 = arith.constant 0 : i32
    return %arg0, %c0_i32 : i32, i32
  }
  func.func @transform_5(%arg0: i32) -> (i32, i32) {
    %c0_i32 = arith.constant 0 : i32
    %c0_i32_0 = arith.constant 0 : i32
    return %arg0, %c0_i32 : i32, i32
  }
  func.func @transform_6(%arg0: i32) -> (i32, i32, i32) {
    %c0_i32 = arith.constant 0 : i32
    %c0_i32_0 = arith.constant 0 : i32
    %c0_i32_1 = arith.constant 0 : i32
    return %arg0, %c0_i32, %c0_i32_0 : i32, i32, i32
  }
}

</mosaic_0001>

<bundles_post_ra>
// kernel: tpu_custom_call.1
= control target key start
LH: loop header
LB: loop body
LE: loop exit
PB: predicated region body
PF: predicated region fallthrough
CT: control target
= control target key end

     0   :  { %12 = vsyncpa [#allocation3], 0  ;;  %s2068_s0 = inlined_call_operand.hbm [shape: f32[1,1024], index: 0, kind: input, shape index: {}]   ;;  %s2069_s1 = inlined_call_operand.hbm [shape: f32[1,1024], index: 1, kind: input, shape index: {}]   ;;  %s2070_s2 = inlined_call_operand.hbm [shape: bf16[1024,128], index: 2, kind: input, shape index: {}]   ;;  %s2071_s3 = inlined_call_operand.vmem [shape: f32[1,128], index: 3, kind: input, shape index: {}]   ;;  %s2072_s4 = inlined_call_operand.hbm [shape: bf16[16,1024], index: 4, kind: input, shape index: {}]   ;;  %s2073_s5 = inlined_call_operand.hbm [shape: bf16[16,1024], index: 5, kind: output, shape index: {0}]   ;;  %s2074_s6 = inlined_call_operand.hbm [shape: f32[1,8,128], index: 6, kind: output, shape index: {1}]  }
   0x1   :  { %13 = vsyncpa [#allocation6], 0 }
   0x2   :  { %14 = vsyncpa [#allocation9], 0 }
   0x3   :  { %15 = vsyncpa [#allocation4], 0 }
   0x4   :  { %16 = vsyncpa [#allocation12], 0  ;;  %s1720_s21 = smov [#allocation5]   ;;  %s1721_s23 = smov [#allocation2]  }
   0x5   :  { %s33_s22 = sshll.u32 %s1720_s21, 4  ;;  %s23_s24 = sshll.u32 %s1721_s23, 4  ;;  %s34_s22 = int_to_ptr.vmem [resolvable:$true] %s33_s22  ;;  %s24_s24 = int_to_ptr.vmem [resolvable:$true] %s23_s24 }
   0x6   :  { %s1578_s27 = scalar_lea.hbm %s2069_s1, 128 }
   0x7   :  { %p1579_p0 = scmp.ne.s32.totalorder %s2069_s1, %s1578_s27  ;;  %p1582_p1 = scmp.lt.u32.totalorder %s1578_s27, %s2069_s1 }
   0x9   :  { %p1584_p2 = pnand %p1582_p1, %p1579_p0 }
   0xb   :  { %1587 = shalt.err (!%p1584_p2)
}
   0xc   :  { %s1588_s8 = scalar_lea.vmem %s34_s22, 128  ;;  %p1593_p4 = scmp.lt.s32.totalorder %s34_s22, %s34_s22 }
   0xd   :  { %p1589_p3 = scmp.ne.s32.totalorder %s34_s22, %s1588_s8  ;;  %p1594_p5 = scmp.lt.s32.totalorder %s1588_s8, %s1588_s8 }
   0xf   :  { %p1595_p6 = por %p1594_p5, %p1593_p4 }
  0x11   :  { %p1596_p7 = pnand %p1595_p6, %p1589_p3 }
  0x13   :  { %1599 = shalt.err (!%p1596_p7)
}
  0x14   :  { %36 = dma.hbm_to_vmem [thread:$0]  %s2069_s1, 128, %s34_s22, [#allocation6]  }
  0x15   :  { %s1600_s13 = scalar_lea.hbm %s2068_s0, 128 }
  0x16   :  { %p1601_p8 = scmp.ne.s32.totalorder %s2068_s0, %s1600_s13  ;;  %p1604_p9 = scmp.lt.u32.totalorder %s1600_s13, %s2068_s0 }
  0x18   :  { %p1606_p10 = pnand %p1604_p9, %p1601_p8 }
  0x1a   :  { %1609 = shalt.err (!%p1606_p10)
}
  0x1b   :  { %s1610_s18 = scalar_lea.vmem %s24_s24, 128  ;;  %p1615_p12 = scmp.lt.s32.totalorder %s24_s24, %s24_s24 }
  0x1c   :  { %p1611_p11 = scmp.ne.s32.totalorder %s24_s24, %s1610_s18  ;;  %p1616_p13 = scmp.lt.s32.totalorder %s1610_s18, %s1610_s18 }
  0x1e   :  { %p1617_p0 = por %p1616_p13, %p1615_p12 }
  0x20   :  { %p1618_p1 = pnand %p1617_p0, %p1611_p11 }
  0x22   :  { %1621 = shalt.err (!%p1618_p1)
}
  0x23   :  { %26 = dma.hbm_to_vmem [thread:$0]  %s2068_s0, 128, %s24_s24, [#allocation3]  }
  0x24   :  { %s1722_s20 = smov [#allocation7]   ;;  %s1622_s25 = scalar_lea.hbm %s2070_s2, 8192 }
  0x25   :  { %s42_s21 = sshll.u32 %s1722_s20, 4  ;;  %p1623_p2 = scmp.ne.s32.totalorder %s2070_s2, %s1622_s25  ;;  %s43_s21 = int_to_ptr.vmem [resolvable:$true] %s42_s21 }
  0x26   :  { %p1626_p3 = scmp.lt.u32.totalorder %s1622_s25, %s2070_s2 }
  0x28   :  { %p1628_p4 = pnand %p1626_p3, %p1623_p2 }
  0x2a   :  { %1631 = shalt.err (!%p1628_p4)
}
  0x2b   :  { %s1632_s30 = scalar_lea.vmem %s43_s21, 8192  ;;  %p1637_p6 = scmp.lt.s32.totalorder %s43_s21, %s43_s21 }
  0x2c   :  { %p1633_p5 = scmp.ne.s32.totalorder %s43_s21, %s1632_s30  ;;  %p1638_p7 = scmp.lt.s32.totalorder %s1632_s30, %s1632_s30 }
  0x2e   :  { %p1639_p8 = por %p1638_p7, %p1637_p6 }
  0x30   :  { %p1640_p9 = pnand %p1639_p8, %p1633_p5 }
  0x32   :  { %1643 = shalt.err (!%p1640_p9)
}
  0x33   :  { %s1723_s0 = smov 64   ;;  %s1724_s24 = smov 4  }
  0x34   :  { %48 = dma.hbm_to_vmem [thread:$0]  %s2070_s2, 8192, %s43_s21, [#allocation6], %s1723_s0, %s1723_s0, %s1724_s24  }
  0x35   :  { %s1725_s9 = smov [#allocation8]   ;;  %s1644_s13 = scalar_lea.hbm %s2072_s4, 1024 }
  0x36   :  { %s56_s10 = sshll.u32 %s1725_s9, 4  ;;  %p1645_p10 = scmp.ne.s32.totalorder %s2072_s4, %s1644_s13  ;;  %s57_s10 = int_to_ptr.vmem [resolvable:$true] %s56_s10 }
  0x37   :  { %p1648_p11 = scmp.lt.u32.totalorder %s1644_s13, %s2072_s4 }
  0x39   :  { %p1650_p12 = pnand %p1648_p11, %p1645_p10 }
  0x3b   :  { %1653 = shalt.err (!%p1650_p12)
}
  0x3c   :  { %s1654_s18 = scalar_lea.vmem %s57_s10, 1024  ;;  %p1659_p0 = scmp.lt.s32.totalorder %s57_s10, %s57_s10 }
  0x3d   :  { %p1655_p13 = scmp.ne.s32.totalorder %s57_s10, %s1654_s18  ;;  %p1660_p1 = scmp.lt.s32.totalorder %s1654_s18, %s1654_s18 }
  0x3f   :  { %p1661_p2 = por %p1660_p1, %p1659_p0 }
  0x41   :  { %p1662_p3 = pnand %p1661_p2, %p1655_p13 }
  0x43   :  { %1665 = shalt.err (!%p1662_p3)
}
  0x44   :  { %s1726_s2 = smov 512   ;;  %s1727_s1 = smov 32  }
  0x45   :  { %62 = dma.hbm_to_vmem [thread:$0]  %s2072_s4, 1024, %s57_s10, [#allocation9], %s1726_s2, %s1726_s2, %s1727_s1  }
  0x46   :  { %1710 = dma.done.wait [#allocation3], 128  }
  0x47   :  { %1711 = vsyncadd [#allocation3], 4294967168 }
  0x48   :  { %1712 = dma.done.wait [#allocation6], 8320  }
  0x49   :  { %1713 = vsyncadd [#allocation6], 4294958976 }
  0x4a   :  { %1714 = dma.done.wait [#allocation9], 1024  }
  0x4b   :  { %1715 = vsyncadd [#allocation9], 4294966272  ;;  %v1442_v0 = vld [vmem:[#allocation7 + $0x40] sm:$0xff]   ;;  %v1446_v4 = vld [vmem:[#allocation7 + $0x48] sm:$0xff]   ;;  %v103_v22 = vlaneseq  ;;  %vm451_vm1 = vcmask 7168   ;;  %s1730_s22 = smov [#allocation10]  }
  0x4c   :  { %v1443_v1 = vld [vmem:[#allocation7 + $0xc0] sm:$0xff]   ;;  %1336 = vmatprep.subr.bf16.mxu0 %v1442_v0  ;;  %v1447_v5 = vld [vmem:[#allocation7 + $0xc8] sm:$0xff]   ;;  %v1450_v8 = vld [vmem:[#allocation7 + $0x50] sm:$0xff]   ;;  %s1226_s23 = sshll.u32 %s1730_s22, 4  ;;  %s1227_s23 = int_to_ptr.vmem [resolvable:$true] %s1226_s23 }
  0x4d   :  { %v1444_v2 = vld [vmem:[#allocation7] sm:$0xff]   ;;  %1358 = vmatprep.subr.bf16.mxu1 %v1443_v1  ;;  %v1448_v6 = vld [vmem:[#allocation7 + $0x8] sm:$0xff]   ;;  %v1451_v9 = vld [vmem:[#allocation7 + $0xd0] sm:$0xff]   ;;  %v1819_v27 = vshrl.u32 %v103_v22, 7  ;;  %s1666_s25 = scalar_lea.vmem %s1227_s23, 1024  ;;  %p1671_p5 = scmp.lt.s32.totalorder %s1227_s23, %s1227_s23 }
  0x4e   :  { %v1445_v3 = vld [vmem:[#allocation7 + $0x80] sm:$0xff]   ;;  %1337 = vmatpush3.bf16.msra.mxu0 %v1444_v2  ;;  %v1449_v7 = vld [vmem:[#allocation7 + $0x88] sm:$0xff]   ;;  %v1452_v10 = vld [vmem:[#allocation7 + $0x10] sm:$0xff]   ;;  %p1667_p4 = scmp.ne.s32.totalorder %s1227_s23, %s1666_s25  ;;  %p1672_p6 = scmp.lt.s32.totalorder %s1666_s25, %s1666_s25 }
  0x4f   :  { %1359 = vmatpush3.bf16.msra.mxu1 %v1445_v3  ;;  %1338 = vmatprep.subr.bf16.mxu0 %v1446_v4  ;;  %v1453_v11 = vld [vmem:[#allocation7 + $0x90] sm:$0xff]   ;;  %v1454_v12 = vld [vmem:[#allocation7 + $0x58] sm:$0xff]   ;;  %v1458_v16 = vld [vmem:[#allocation7 + $0x60] sm:$0xff]   ;;  %v109_v32 = vsub.s32 1, %v1819_v27  ;;  %v117_v35 = vsub.s32 3, %v1819_v27  ;;  %v105_v39 = vsub.s32 0, %v1819_v27 }
  0x50   :  { %1360 = vmatprep.subr.bf16.mxu1 %v1447_v5  ;;  %v1455_v13 = vld [vmem:[#allocation7 + $0xd8] sm:$0xff]   ;;  %v1459_v17 = vld [vmem:[#allocation7 + $0xe0] sm:$0xff]   ;;  %v1462_v20 = vld [vmem:[#allocation7 + $0x68] sm:$0xff]   ;;  %v113_v40 = vsub.s32 2, %v1819_v27  ;;  %vm295_vm0 = vcmp.lt.s32.totalorder %v1819_v27, 2  ;;  %p1673_p7 = por %p1672_p6, %p1671_p5 }
  0x51   :  { %v1456_v14 = vld [vmem:[#allocation7 + $0x18] sm:$0xff]   ;;  %v1460_v18 = vld [vmem:[#allocation7 + $0x20] sm:$0xff]   ;;  %v1463_v21 = vld [vmem:[#allocation7 + $0xe8] sm:$0xff]  }
  0x52   :  { %1339 = vmatpush3.bf16.msra.mxu0 %v1448_v6  ;;  %v1457_v15 = vld [vmem:[#allocation7 + $0x98] sm:$0xff]   ;;  %v1461_v19 = vld [vmem:[#allocation7 + $0xa0] sm:$0xff]   ;;  %v1464_v23 = vld [vmem:[#allocation7 + $0x28] sm:$0xff]   ;;  %p1674_p8 = pnand %p1673_p7, %p1667_p4 }
  0x53   :  { %1361 = vmatpush3.bf16.msra.mxu1 %v1449_v7  ;;  %1340 = vmatprep.subr.bf16.mxu0 %v1450_v8  ;;  %v1465_v24 = vld [vmem:[#allocation7 + $0xa8] sm:$0xff]   ;;  %v1466_v25 = vld [vmem:[#allocation7 + $0x70] sm:$0xff]   ;;  %v1470_v30 = vld [vmem:[#allocation7 + $0x78] sm:$0xff]  }
  0x54   :  { %1362 = vmatprep.subr.bf16.mxu1 %v1451_v9  ;;  %v1467_v26 = vld [vmem:[#allocation7 + $0xf0] sm:$0xff]   ;;  %v1471_v31 = vld [vmem:[#allocation7 + $0xf8] sm:$0xff]   ;;  %v78_v38 = vld [vmem:[#allocation8] sm:$0xff] }
  0x55   :  { %v1468_v28 = vld [vmem:[#allocation7 + $0x30] sm:$0xff]   ;;  %v1472_v33 = vld [vmem:[#allocation7 + $0x38] sm:$0xff]   ;;  %v82_v41 = vld [vmem:[#allocation8 + $0x20] sm:$0xff]  ;;  %v1829_v42 = vunpack.c.l.bf16 %v78_v38  ;;  %v1831_v43 = vunpack.c.h.bf16 %v78_v38 }
  0x56   :  { %1341 = vmatpush3.bf16.msra.mxu0 %v1452_v10  ;;  %v1469_v29 = vld [vmem:[#allocation7 + $0xb0] sm:$0xff]   ;;  %v1473_v34 = vld [vmem:[#allocation7 + $0xb8] sm:$0xff]   ;;  %v79_v46 = vld [vmem:[#allocation8 + $0x8] sm:$0xff]  ;;  %v1835_v48 = vunpack.c.l.bf16 %v82_v41  ;;  %v1837_v49 = vunpack.c.h.bf16 %v82_v41  ;;  %v121_v41 = vsub.s32 4, %v1819_v27 }
  0x57   :  { %1363 = vmatpush3.bf16.msra.mxu1 %v1453_v11  ;;  %1342 = vmatprep.subr.bf16.mxu0 %v1454_v12  ;;  %v1823_v36 = vld [vmem:[#allocation2] sm:$0xff]  ;;  %v1825_v37 = vld [vmem:[#allocation5] sm:$0xff]  ;;  %v83_v47 = vld [vmem:[#allocation8 + $0x28] sm:$0xff]  ;;  %v1839_v50 = vunpack.c.l.bf16 %v79_v46  ;;  %v1841_v51 = vunpack.c.h.bf16 %v79_v46 }
  0x58   :  { %1364 = vmatprep.subr.bf16.mxu1 %v1455_v13  ;;  %v110_v44 = vrot.slane %v1825_v37, %v109_v32  ;;  %v167_v45 = vrot.slane %v1823_v36, %v109_v32  ;;  %v1474_v52 = vld [vmem:[#allocation7 + $0x140] sm:$0xff]   ;;  %v1844_v54 = vunpack.c.l.bf16 %v83_v47  ;;  %v1846_v55 = vunpack.c.h.bf16 %v83_v47  ;;  %v1480_v32 = vld [vmem:[#allocation7 + $0x108] sm:$0xff]   ;;  %v1483_v38 = vld [vmem:[#allocation7 + $0x1d0] sm:$0xff]  }
  0x59   :  { %v118_v56 = vrot.slane %v1825_v37, %v117_v35  ;;  %v1475_v57 = vld [vmem:[#allocation7 + $0x1c0] sm:$0xff]   ;;  %v175_v59 = vrot.slane %v1823_v36, %v117_v35  ;;  %v106_v60 = vrot.slane %v1825_v37, %v105_v39  ;;  %v163_v61 = vrot.slane %v1823_v36, %v105_v39  ;;  %v1486_v46 = vld [vmem:[#allocation7 + $0x158] sm:$0xff]  }
  0x5a   :  { %1343 = vmatpush3.bf16.msra.mxu0 %v1456_v14  ;;  %v144_v53 = vmul.f32 %v110_v44, %v1831_v43  ;;  %v152_v58 = vmul.f32 %v110_v44, %v1837_v49  ;;  %v114_v1 = vrot.slane %v1825_v37, %v113_v40  ;;  %v171_v5 = vrot.slane %v1823_v36, %v113_v40  ;;  %v1484_v40 = vld [vmem:[#allocation7 + $0x110] sm:$0xff]   ;;  %v1487_v47 = vld [vmem:[#allocation7 + $0x1d8] sm:$0xff]  }
  0x5b   :  { %1365 = vmatpush3.bf16.msra.mxu1 %v1457_v15  ;;  %1344 = vmatprep.subr.bf16.mxu0 %v1458_v16  ;;  %v146_v63 = vmul.f32 %v118_v56, %v1841_v51  ;;  %v154_v0 = vmul.f32 %v118_v56, %v1846_v55  ;;  %v143_v3 = vmul.f32 %v106_v60, %v1829_v42  ;;  %v125_v35 = vsub.s32 5, %v1819_v27  ;;  %v1485_v44 = vld [vmem:[#allocation7 + $0x190] sm:$0xff]  }
  0x5c   :  { %1366 = vmatprep.subr.bf16.mxu1 %v1459_v17  ;;  %v201_v62 = vadd.f32 %v167_v45, %v144_v53  ;;  %v209_v2 = vadd.f32 %v167_v45, %v152_v58  ;;  %v151_v4 = vmul.f32 %v106_v60, %v1835_v48  ;;  %v145_v8 = vmul.f32 %v114_v1, %v1839_v50  ;;  %v84_v58 = vld [vmem:[#allocation8 + $0x30] sm:$0xff]  ;;  %v81_v60 = vld [vmem:[#allocation8 + $0x18] sm:$0xff] }
  0x5d   :  { %v203_v6 = vadd.f32 %v175_v59, %v146_v63  ;;  %v211_v7 = vadd.f32 %v175_v59, %v154_v0  ;;  %v200_v9 = vadd.f32 %v163_v61, %v143_v3  ;;  %v153_v11 = vmul.f32 %v114_v1, %v1844_v54  ;;  %v1490_v0 = vld [vmem:[#allocation7 + $0x160] sm:$0xff]  }
  0x5e   :  { %1345 = vmatpush3.bf16.msra.mxu0 %v1460_v18  ;;  %1506 = vtanh.f32 %v201_v62  ;;  %v208_v10 = vadd.f32 %v163_v61, %v151_v4  ;;  %v202_v12 = vadd.f32 %v171_v5, %v145_v8  ;;  %v133_v39 = vsub.s32 7, %v1819_v27 }
  0x5f   :  { %1367 = vmatpush3.bf16.msra.mxu1 %v1461_v19  ;;  %1346 = vmatprep.subr.bf16.mxu0 %v1462_v20  ;;  %1508 = vtanh.f32 %v209_v2  ;;  %v210_v13 = vadd.f32 %v171_v5, %v153_v11  ;;  %v129_v45 = vsub.s32 6, %v1819_v27  ;;  %v126_v53 = vrot.slane %v1825_v37, %v125_v35  ;;  %v85_v5 = vld [vmem:[#allocation8 + $0x38] sm:$0xff] }
  0x60   :  { %1368 = vmatprep.subr.bf16.mxu1 %v1463_v21  ;;  %1510 = vtanh.f32 %v203_v6  ;;  %v1476_v21 = vld [vmem:[#allocation7 + $0x100] sm:$0xff]   ;;  %v122_v56 = vrot.slane %v1825_v37, %v121_v41  ;;  %v183_v59 = vrot.slane %v1823_v36, %v125_v35  ;;  %v134_v61 = vrot.slane %v1825_v37, %v133_v39  ;;  %v1489_v6 = vld [vmem:[#allocation7 + $0x198] sm:$0xff]  }
  0x61   :  { %1512 = vtanh.f32 %v211_v7  ;;  %v191_v62 = vrot.slane %v1823_v36, %v133_v39  ;;  %v130_v63 = vrot.slane %v1825_v37, %v129_v45  ;;  %v1899_v3 = vunpack.c.l.bf16 %v84_v58 }
  0x62   :  { %1347 = vmatpush3.bf16.msra.mxu0 %v1464_v23  ;;  %1514 = vtanh.f32 %v200_v9  ;;  %v1901_v4 = vunpack.c.h.bf16 %v84_v58  ;;  %v1903_v7 = vunpack.c.l.bf16 %v81_v60  ;;  %v1905_v8 = vunpack.c.h.bf16 %v81_v60  ;;  %v1501_v58 = vld [vmem:[#allocation7 + $0x1b0] sm:$0xff]   ;;  %v1504_v60 = vld [vmem:[#allocation7 + $0x138] sm:$0xff]  }
  0x63   :  { %1369 = vmatpush3.bf16.msra.mxu1 %v1465_v24  ;;  %1348 = vmatprep.subr.bf16.mxu0 %v1466_v25  ;;  %1516 = vtanh.f32 %v208_v10  ;;  %v1477_v24 = vld [vmem:[#allocation7 + $0x180] sm:$0xff]   ;;  %v1907_v9 = vunpack.c.l.bf16 %v85_v5  ;;  %v1909_v37 = vunpack.c.h.bf16 %v85_v5 }
  0x64   :  { %1370 = vmatprep.subr.bf16.mxu1 %v1467_v26  ;;  %1518 = vtanh.f32 %v202_v12  ;;  %v1491_v10 = vld [vmem:[#allocation7 + $0x1e0] sm:$0xff]   ;;  %v156_v12 = vmul.f32 %v126_v53, %v1901_v4 }
  0x65   :  { %1520 = vtanh.f32 %v210_v13  ;;  %v157_v39 = vmul.f32 %v130_v63, %v1907_v9 }
  0x66   :  { %1349 = vmatpush3.bf16.msra.mxu0 %v1468_v28  ;;  %v1478_v28 = vld [vmem:[#allocation7 + $0x148] sm:$0xff]  }
  0x67   :  { %1371 = vmatpush3.bf16.msra.mxu1 %v1469_v29  ;;  %1350 = vmatprep.subr.bf16.mxu0 %v1470_v30  ;;  %v1479_v30 = vld [vmem:[#allocation7 + $0x1c8] sm:$0xff]  }
  0x68   :  { %1372 = vmatprep.subr.bf16.mxu1 %v1471_v31  ;;  %v1861_v14 = vpop.eup %1506 }
  0x69   :  { %v1863_v15 = vpop.eup %1508 }
  0x6a   :  { %1351 = vmatpush3.bf16.msra.mxu0 %v1472_v33  ;;  %v1865_v16 = vpop.eup %1510  ;;  %v233_v17 = vpack.c.bf16 %v1863_v15, %v1861_v14  ;;  %v1481_v33 = vld [vmem:[#allocation7 + $0x188] sm:$0xff]  }
  0x6b   :  { %1373 = vmatpush3.bf16.msra.mxu1 %v1473_v34  ;;  %1380 = vmatprep.subr.bf16.mxu0 %v1474_v52  ;;  %v1869_v18 = vpop.eup %1512  ;;  %v1482_v34 = vld [vmem:[#allocation7 + $0x150] sm:$0xff]   ;;  %v1488_v52 = vld [vmem:[#allocation7 + $0x118] sm:$0xff]  }
  0x6c   :  { %1402 = vmatprep.subr.bf16.mxu1 %v1475_v57  ;;  %v1871_v19 = vpop.eup %1514  ;;  %1029 = vmatprep.mubr.bf16.mxu0 %v233_v17  ;;  %v235_v20 = vpack.c.bf16 %v1869_v18, %v1865_v16  ;;  %v80_v57 = vld [vmem:[#allocation8 + $0x10] sm:$0xff]  ;;  %v179_v17 = vrot.slane %v1823_v36, %v121_v41 }
  0x6d   :  { %v1875_v23 = vpop.eup %1516  ;;  %v1895_v1 = vunpack.c.l.bf16 %v80_v57  ;;  %v1897_v2 = vunpack.c.h.bf16 %v80_v57  ;;  %v1502_v57 = vld [vmem:[#allocation7 + $0x178] sm:$0xff]  }
  0x6e   :  { %v1877_v25 = vpop.eup %1518  ;;  %1070 = vmatprep.mubr.bf16.mxu1 %v235_v20  ;;  %v232_v26 = vpack.c.bf16 %v1875_v23, %v1871_v19  ;;  %v1492_v20 = vld [vmem:[#allocation7 + $0x120] sm:$0xff]  }
  0x6f   :  { %v1881_v29 = vpop.eup %1520  ;;  %v148_v11 = vmul.f32 %v126_v53, %v1897_v2  ;;  %v147_v13 = vmul.f32 %v122_v56, %v1895_v1  ;;  %v1499_v53 = vld [vmem:[#allocation7 + $0x1f0] sm:$0xff]  }
  0x70   :  { %1030 = vmatmul.mubr.bf16.vlgmr.msra.gmra.mrb[0].mxu0 %v232_v26  ;;  %v234_v31 = vpack.c.bf16 %v1881_v29, %v1877_v25  ;;  %v155_v26 = vmul.f32 %v122_v56, %v1899_v3  ;;  %v1500_v56 = vld [vmem:[#allocation7 + $0x130] sm:$0xff]  }
  0x71   :  { %1381 = vmatpush3.bf16.msra.mxu0 %v1476_v21  ;;  %v150_v21 = vmul.f32 %v134_v61, %v1905_v8  ;;  %v204_v41 = vadd.f32 %v179_v17, %v147_v13 }
  0x72   :  { %1071 = vmatmul.mubr.bf16.vlgmr.msra.gmra.mrb[0].mxu1 %v234_v31  ;;  %1382 = vmatprep.subr.bf16.mxu0 %v1478_v28  ;;  %v1494_v28 = vld [vmem:[#allocation7 + $0x168] sm:$0xff]   ;;  %v213_v31 = vadd.f32 %v183_v59, %v156_v12 }
  0x73   :  { %1403 = vmatpush3.bf16.msra.mxu1 %v1477_v24  ;;  %v158_v24 = vmul.f32 %v134_v61, %v1909_v37  ;;  %v207_v35 = vadd.f32 %v191_v62, %v150_v21 }
  0x74   :  { %1404 = vmatprep.subr.bf16.mxu1 %v1479_v30  ;;  %v205_v30 = vadd.f32 %v183_v59, %v148_v11  ;;  %v1503_v59 = vld [vmem:[#allocation7 + $0x1f8] sm:$0xff]  }
  0x75   :  { %1383 = vmatpush3.bf16.msra.mxu0 %v1480_v32  ;;  %v149_v32 = vmul.f32 %v130_v63, %v1903_v7  ;;  %v1505_v63 = vld [vmem:[#allocation7 + $0x1b8] sm:$0xff]  }
  0x76   :  { %1384 = vmatprep.subr.bf16.mxu0 %v1482_v34  ;;  %v1493_v34 = vld [vmem:[#allocation7 + $0x1a0] sm:$0xff]   ;;  %1522 = vtanh.f32 %v205_v30 }
  0x77   :  { %1405 = vmatpush3.bf16.msra.mxu1 %v1481_v33  ;;  %v187_v33 = vrot.slane %v1823_v36, %v129_v45  ;;  %1524 = vtanh.f32 %v213_v31  ;;  %v1497_v36 = vld [vmem:[#allocation7 + $0x1a8] sm:$0xff]  }
  0x78   :  { %1406 = vmatprep.subr.bf16.mxu1 %v1483_v38  ;;  %v215_v38 = vadd.f32 %v191_v62, %v158_v24  ;;  %1526 = vtanh.f32 %v207_v35 }
  0x79   :  { %1385 = vmatpush3.bf16.msra.mxu0 %v1484_v40  ;;  %v1495_v40 = vld [vmem:[#allocation7 + $0x1e8] sm:$0xff]   ;;  %v214_v45 = vadd.f32 %v187_v33, %v157_v39 }
  0x7a   :  { %1386 = vmatprep.subr.bf16.mxu0 %v1486_v46  ;;  %v212_v46 = vadd.f32 %v179_v17, %v155_v26  ;;  %1528 = vtanh.f32 %v215_v38  ;;  %v1263_v26 = vld [vmem:[%s2071_s3] ss:$0 sm:$0xff]  ;;  %s1729_s3 = smov 125  }
  0x7b   :  { %1407 = vmatpush3.bf16.msra.mxu1 %v1485_v44  ;;  %v1496_v44 = vld [vmem:[#allocation7 + $0x128] sm:$0xff]   ;;  %1530 = vtanh.f32 %v204_v41 }
  0x7c   :  { %1408 = vmatprep.subr.bf16.mxu1 %v1487_v47  ;;  %v1498_v47 = vld [vmem:[#allocation7 + $0x170] sm:$0xff]   ;;  %1532 = vtanh.f32 %v212_v46 }
  0x7d   :  { %1387 = vmatpush3.bf16.msra.mxu0 %v1488_v52  ;;  %v206_v52 = vadd.f32 %v187_v33, %v149_v32 }
  0x7e   :  { %1388 = vmatprep.subr.bf16.mxu0 %v1490_v0 }
  0x7f   :  { %1409 = vmatpush3.bf16.msra.mxu1 %v1489_v6  ;;  %1534 = vtanh.f32 %v206_v52 }
  0x80   :  { %1410 = vmatprep.subr.bf16.mxu1 %v1491_v10  ;;  %1536 = vtanh.f32 %v214_v45  ;;  %v1921_v61 = vpop.eup %1522 }
  0x81   :  { %1389 = vmatpush3.bf16.msra.mxu0 %v1492_v20  ;;  %v1923_v62 = vpop.eup %1524 }
  0x82   :  { %1390 = vmatprep.subr.bf16.mxu0 %v1494_v28  ;;  %v1925_v0 = vpop.eup %1526  ;;  %v237_v5 = vpack.c.bf16 %v1923_v62, %v1921_v61 }
  0x83   :  { %1411 = vmatpush3.bf16.msra.mxu1 %v1493_v34 }
  0x84   :  { %1412 = vmatprep.subr.bf16.mxu1 %v1495_v40  ;;  %v1929_v6 = vpop.eup %1528  ;;  %1111 = vmatprep.mubr.bf16.mxu0 %v237_v5 }
  0x85   :  { %1391 = vmatpush3.bf16.msra.mxu0 %v1496_v44  ;;  %v1931_v10 = vpop.eup %1530  ;;  %v239_v11 = vpack.c.bf16 %v1929_v6, %v1925_v0 }
  0x86   :  { %1392 = vmatprep.subr.bf16.mxu0 %v1498_v47  ;;  %v1935_v12 = vpop.eup %1532 }
  0x87   :  { %1413 = vmatpush3.bf16.msra.mxu1 %v1497_v36  ;;  %1152 = vmatprep.mubr.bf16.mxu1 %v239_v11  ;;  %v236_v17 = vpack.c.bf16 %v1935_v12, %v1931_v10 }
  0x88   :  { %1414 = vmatprep.subr.bf16.mxu1 %v1499_v53 }
  0x89   :  { %1393 = vmatpush3.bf16.msra.mxu0 %v1500_v56  ;;  %v1937_v13 = vpop.eup %1534 }
  0x8a   :  { %1394 = vmatprep.subr.bf16.mxu0 %v1502_v57  ;;  %v1941_v20 = vpop.eup %1536 }
  0x8b   :  { %1415 = vmatpush3.bf16.msra.mxu1 %v1501_v58  ;;  %v238_v21 = vpack.c.bf16 %v1941_v20, %v1937_v13 }
  0x8c   :  { %1416 = vmatprep.subr.bf16.mxu1 %v1503_v59 }
  0x8d   :  { %1395 = vmatpush3.bf16.msra.mxu0 %v1504_v60 }
  0x8f   :  { %1417 = vmatpush3.bf16.msra.mxu1 %v1505_v63 }
  0x90   :  { %1112 = vmatmul.mubr.bf16.vlgmr.msra.gmra.mrb[4].mxu0 %v236_v17 }
  0x92   :  { %1153 = vmatmul.mubr.bf16.vlgmr.msra.gmra.mrb[4].mxu1 %v238_v21 }
 0x143   :  { %v1352_v24 = vpop.f32.mrb[0].mxu0 }
 0x144   :  { %v1353_v28 = vpop.f32.mrb[1].mxu0 }
 0x145   :  { %v1374_v30 = vpop.f32.mrb[0].mxu1  ;;  %v1354_v31 = vadd.f32 %v1353_v28, %v1352_v24  ;;  %v1355_v32 = vpop.f32.mrb[2].mxu0 }
 0x146   :  { %v1375_v33 = vpop.f32.mrb[1].mxu1  ;;  %v1356_v34 = vpop.f32.mrb[3].mxu0 }
 0x147   :  { %v1032_v35 = vadd.f32 %v1354_v31, %v1263_v26  ;;  %v1376_v38 = vadd.f32 %v1375_v33, %v1374_v30  ;;  %v1377_v39 = vpop.f32.mrb[2].mxu1  ;;  %v1357_v40 = vadd.f32 %v1356_v34, %v1355_v32  ;;  %v302_v31 = vmul.f32 0.5, %v1831_v43 }
 0x148   :  { %v1378_v41 = vpop.f32.mrb[3].mxu1  ;;  %v303_v32 = vmul.f32 0.5, %v1839_v50  ;;  %v304_v33 = vmul.f32 0.5, %v1841_v51  ;;  %v305_v34 = vmul.f32 0.5, %v1895_v1 }
 0x149   :  { %v1073_v44 = vadd.f32 %v1376_v38, %v1032_v35  ;;  %v1035_v46 = vadd.f32 %v1357_v40, %v1263_v26  ;;  %v1379_v47 = vadd.f32 %v1378_v41, %v1377_v39  ;;  %v301_v26 = vmul.f32 0.5, %v1829_v42 }
 0x14a   :  { %v318_v38 = vmul.f32 %v302_v31, %v1831_v43  ;;  %v319_v39 = vmul.f32 %v303_v32, %v1839_v50  ;;  %v306_v40 = vmul.f32 0.5, %v1897_v2  ;;  %v320_v41 = vmul.f32 %v304_v33, %v1841_v51 }
 0x14b   :  { %v1076_v52 = vadd.f32 %v1379_v47, %v1035_v46  ;;  %v317_v35 = vmul.f32 %v301_v26, %v1829_v42  ;;  %v307_v46 = vmul.f32 0.5, %v1903_v7  ;;  %v321_v47 = vmul.f32 %v305_v34, %v1895_v1 }
 0x14c   :  { %v351_v42 = vmul.f32 %v1871_v19, %v1871_v19  ;;  %v352_v43 = vmul.f32 %v1861_v14, %v1861_v14  ;;  %v353_v50 = vmul.f32 %v1877_v25, %v1877_v25  ;;  %v354_v51 = vmul.f32 %v1865_v16, %v1865_v16 }
 0x14d   :  { %v323_v1 = vmul.f32 %v307_v46, %v1903_v7  ;;  %v358_v7 = vmul.f32 %v1925_v0, %v1925_v0 }
 0x163   :  { %v1396_v36 = vpop.f32.mrb[4].mxu0 }
 0x164   :  { %v1397_v45 = vpop.f32.mrb[5].mxu0 }
 0x165   :  { %v1418_v53 = vpop.f32.mrb[4].mxu1  ;;  %v1398_v56 = vadd.f32 %v1397_v45, %v1396_v36  ;;  %v1399_v57 = vpop.f32.mrb[6].mxu0  ;;  %v308_v36 = vmul.f32 0.5, %v1905_v8  ;;  %v322_v45 = vmul.f32 %v306_v40, %v1897_v2  ;;  %v356_v2 = vmul.f32 %v1921_v61, %v1921_v61 }
 0x166   :  { %v1419_v58 = vpop.f32.mrb[5].mxu1  ;;  %v1400_v59 = vpop.f32.mrb[7].mxu0 }
 0x167   :  { %v1114_v60 = vadd.f32 %v1398_v56, %v1073_v44  ;;  %v1420_v63 = vadd.f32 %v1419_v58, %v1418_v53  ;;  %v1421_v5 = vpop.f32.mrb[6].mxu1  ;;  %v1401_v11 = vadd.f32 %v1400_v59, %v1399_v57  ;;  %v333_v44 = vadd.f32 %v318_v38, %v317_v35 }
 0x168   :  { %v1422_v17 = vpop.f32.mrb[7].mxu1  ;;  %v355_v57 = vmul.f32 %v1931_v10, %v1931_v10  ;;  %v324_v58 = vmul.f32 %v308_v36, %v1905_v8  ;;  %v367_v59 = vsub.f32 1.0, %v351_v42  ;;  %v372_v26 = vsub.f32 1.0, %v356_v2 }
 0x169   :  { %v1948_v21 = vadd.f32 %v1420_v63, %v1114_v60  ;;  %v1117_v24 = vadd.f32 %v1401_v11, %v1076_v52  ;;  %v1423_v28 = vadd.f32 %v1422_v17, %v1421_v5  ;;  %v334_v52 = vadd.f32 %v333_v44, %v319_v39 }
 0x16a   :  { %v368_v60 = vsub.f32 1.0, %v352_v43  ;;  %v357_v5 = vmul.f32 %v1937_v13, %v1937_v13  ;;  %v369_v11 = vsub.f32 1.0, %v353_v50  ;;  %v370_v17 = vsub.f32 1.0, %v354_v51 }
 0x16b   :  { %v1950_v30 = vadd.f32 %v1423_v28, %v1117_v24  ;;  %1161 = vmax.xlane.f32.xlu0 %v1948_v21  ;;  %v335_v53 = vadd.f32 %v334_v52, %v320_v41  ;;  %v371_v24 = vsub.f32 1.0, %v355_v57  ;;  %v383_v31 = vadd.f32 1e-08, %v367_v59 }
 0x16c   :  { %v384_v32 = vadd.f32 1e-08, %v368_v60  ;;  %v385_v33 = vadd.f32 1e-08, %v369_v11  ;;  %v373_v35 = vsub.f32 1.0, %v357_v5  ;;  %v374_v39 = vsub.f32 1.0, %v358_v7 }
 0x16d   :  { %v336_v56 = vadd.f32 %v335_v53, %v321_v47  ;;  %v386_v8 = vadd.f32 1e-08, %v370_v17  ;;  %v387_v38 = vadd.f32 1e-08, %v371_v24  ;;  %1538 = vlog2.f32 %v383_v31 }
 0x16e   :  { %v388_v40 = vadd.f32 1e-08, %v372_v26  ;;  %1540 = vlog2.f32 %v384_v32  ;;  %v389_v41 = vadd.f32 1e-08, %v373_v35  ;;  %v390_v44 = vadd.f32 1e-08, %v374_v39 }
 0x16f   :  { %1163 = vmax.xlane.f32.xlu0 %v1950_v30  ;;  %v337_v63 = vadd.f32 %v336_v56, %v322_v45  ;;  %1542 = vlog2.f32 %v385_v33  ;;  %v360_v26 = vmul.f32 %v1863_v15, %v1863_v15  ;;  %v361_v32 = vmul.f32 %v1881_v29, %v1881_v29 }
 0x170   :  { %1544 = vlog2.f32 %v386_v8  ;;  %v362_v35 = vmul.f32 %v1869_v18, %v1869_v18  ;;  %v363_v39 = vmul.f32 %v1935_v12, %v1935_v12 }
 0x171   :  { %v338_v28 = vadd.f32 %v337_v63, %v323_v1  ;;  %1546 = vlog2.f32 %v387_v38  ;;  %v376_v33 = vsub.f32 1.0, %v360_v26  ;;  %v377_v8 = vsub.f32 1.0, %v361_v32 }
 0x172   :  { %1548 = vlog2.f32 %v388_v40  ;;  %v378_v40 = vsub.f32 1.0, %v362_v35 }
 0x173   :  { %v339_v34 = vadd.f32 %v338_v28, %v324_v58  ;;  %1550 = vlog2.f32 %v389_v41  ;;  %v359_v28 = vmul.f32 %v1875_v23, %v1875_v23  ;;  %v392_v38 = vadd.f32 1e-08, %v376_v33 }
 0x174   :  { %1552 = vlog2.f32 %v390_v44  ;;  %v393_v41 = vadd.f32 1e-08, %v377_v8  ;;  %v364_v44 = vmul.f32 %v1923_v62, %v1923_v62 }
 0x175   :  { %340 = vadd.xlane.f32.xlu0 %v339_v34  ;;  %v375_v31 = vsub.f32 1.0, %v359_v28 }
 0x177   :  { %v1539_v46 = vpop.eup %1538  ;;  %v391_v34 = vadd.f32 1e-08, %v375_v31 }
 0x178   :  { %v1541_v47 = vpop.eup %1540  ;;  %v400_v52 = vmul.f32 0.6931472, %v1539_v46  ;;  %v379_v46 = vsub.f32 1.0, %v363_v39 }
 0x179   :  { %v1543_v36 = vpop.eup %1542  ;;  %v402_v45 = vmul.f32 0.6931472, %v1541_v47  ;;  %1554 = vlog2.f32 %v391_v34  ;;  %v394_v47 = vadd.f32 1e-08, %v378_v40 }
 0x17a   :  { %v1545_v53 = vpop.eup %1544  ;;  %v404_v42 = vmul.f32 0.6931472, %v1543_v36  ;;  %1556 = vlog2.f32 %v392_v38  ;;  %v310_v36 = vmul.f32 0.5, %v1837_v49 }
 0x17b   :  { %v1547_v43 = vpop.eup %1546  ;;  %v406_v50 = vmul.f32 0.6931472, %v1545_v53  ;;  %v431_v51 = vadd.f32 %v402_v45, %v400_v52  ;;  %1558 = vlog2.f32 %v393_v41  ;;  %v309_v52 = vmul.f32 0.5, %v1835_v48 }
 0x17c   :  { %v1549_v1 = vpop.eup %1548  ;;  %v408_v56 = vmul.f32 0.6931472, %v1547_v43  ;;  %v365_v45 = vmul.f32 %v1941_v20, %v1941_v20  ;;  %v380_v53 = vsub.f32 1.0, %v364_v44  ;;  %1560 = vlog2.f32 %v394_v47 }
 0x17d   :  { %v432_v57 = vadd.f32 %v431_v51, %v404_v42  ;;  %v1551_v2 = vpop.eup %1550  ;;  %v410_v58 = vmul.f32 0.6931472, %v1549_v1  ;;  %v395_v42 = vadd.f32 1e-08, %v379_v46  ;;  %v325_v51 = vmul.f32 %v309_v52, %v1835_v48 }
 0x17e   :  { %v1553_v60 = vpop.eup %1552  ;;  %v412_v63 = vmul.f32 0.6931472, %v1551_v2  ;;  %v326_v1 = vmul.f32 %v310_v36, %v1837_v49  ;;  %v366_v2 = vmul.f32 %v1929_v6, %v1929_v6  ;;  %v315_v52 = vmul.f32 0.5, %v1907_v9 }
 0x17f   :  { %v433_v59 = vadd.f32 %v432_v57, %v406_v50  ;;  %v414_v11 = vmul.f32 0.6931472, %v1553_v60  ;;  %v311_v50 = vmul.f32 0.5, %v1844_v54  ;;  %v312_v57 = vmul.f32 0.5, %v1846_v55 }
 0x180   :  { %1562 = vlog2.f32 %v395_v42  ;;  %v382_v48 = vsub.f32 1.0, %v366_v2 }
 0x181   :  { %v434_v5 = vadd.f32 %v433_v59, %v408_v56  ;;  %v396_v59 = vadd.f32 1e-08, %v380_v53  ;;  %v327_v60 = vmul.f32 %v311_v50, %v1844_v54  ;;  %v328_v28 = vmul.f32 %v312_v57, %v1846_v55 }
 0x182   :  { %v314_v54 = vmul.f32 0.5, %v1901_v4  ;;  %v398_v8 = vadd.f32 1e-08, %v382_v48  ;;  %v331_v50 = vmul.f32 %v315_v52, %v1907_v9 }
 0x183   :  { %v435_v17 = vadd.f32 %v434_v5, %v410_v58  ;;  %v1555_v43 = vpop.eup %1554  ;;  %v381_v58 = vsub.f32 1.0, %v365_v45  ;;  %1564 = vlog2.f32 %v396_v59 }
 0x184   :  { %v1557_v56 = vpop.eup %1556  ;;  %v416_v5 = vmul.f32 0.6931472, %v1555_v43  ;;  %v330_v36 = vmul.f32 %v314_v54, %v1901_v4 }
 0x185   :  { %v436_v7 = vadd.f32 %v435_v17, %v412_v63  ;;  %v342_v63 = vadd.f32 %v326_v1, %v325_v51  ;;  %v1559_v17 = vpop.eup %1558 }
 0x186   :  { %v420_v31 = vmul.f32 0.6931472, %v1559_v17  ;;  %v1561_v33 = vpop.eup %1560 }
 0x187   :  { %v437_v24 = vadd.f32 %v436_v7, %v414_v11  ;;  %v418_v11 = vmul.f32 0.6931472, %v1557_v56  ;;  %v313_v7 = vmul.f32 0.5, %v1899_v3  ;;  %v343_v26 = vadd.f32 %v342_v63, %v327_v60 }
 0x188   :  { %v422_v41 = vmul.f32 0.6931472, %v1561_v33 }
 0x189   :  { %438 = vadd.xlane.f32.xlu0 %v437_v24  ;;  %v397_v24 = vadd.f32 1e-08, %v381_v58  ;;  %v440_v32 = vadd.f32 %v418_v11, %v416_v5  ;;  %v329_v39 = vmul.f32 %v313_v7, %v1899_v3  ;;  %v344_v40 = vadd.f32 %v343_v26, %v328_v28 }
 0x18a   :  { %v1563_v46 = vpop.eup %1562  ;;  %v316_v3 = vmul.f32 0.5, %v1909_v37 }
 0x18b   :  { %1566 = vlog2.f32 %v397_v24  ;;  %v441_v44 = vadd.f32 %v440_v32, %v420_v31  ;;  %v345_v45 = vadd.f32 %v344_v40, %v329_v39  ;;  %v424_v53 = vmul.f32 0.6931472, %v1563_v46 }
 0x18c   :  { %v332_v58 = vmul.f32 %v316_v3, %v1909_v37  ;;  %v1728_v32 = vmov 0.0  }
 0x18d   :  { %v442_v42 = vadd.f32 %v441_v44, %v422_v41  ;;  %v1565_v43 = vpop.eup %1564  ;;  %v346_v51 = vadd.f32 %v345_v45, %v330_v36  ;;  %v1262_v33 = vsel %vm295_vm0, 1.0, %v1728_v32  ;;  %v1333_v32 = vpack.c.bf16 %v1869_v18, %v1881_v29 }
 0x18e   :  { %v426_v1 = vmul.f32 0.6931472, %v1565_v43 }
 0x18f   :  { %v443_v56 = vadd.f32 %v442_v42, %v424_v53  ;;  %v347_v59 = vadd.f32 %v346_v51, %v331_v50  ;;  %285 = vst [vmem:[#allocation10 + $0x28] sm:$0xff] %v1333_v32 }
 0x191   :  { %v444_v4 = vadd.f32 %v443_v56, %v426_v1  ;;  %v348_v11 = vadd.f32 %v347_v59, %v332_v58 }
 0x195   :  { %v1567_v57 = vpop.eup %1566 }
 0x196   :  { %v428_v60 = vmul.f32 0.6931472, %v1567_v57 }
 0x198   :  { %v445_v7 = vadd.f32 %v444_v4, %v428_v60 }
 0x1f8   :  { %v1162_v49 = vpop.xlane.xlu0 %1161 }
 0x1f9   :  { %v1165_v34 = vsub.f32 %v1948_v21, %v1162_v49 }
 0x1fb   :  { %v1167_v35 = vmul.f32 1.442695, %v1165_v34 }
 0x1fc   :  { %v1164_v38 = vpop.xlane.xlu0 %1163 }
 0x1fd   :  { %v1166_v55 = vsub.f32 %v1950_v30, %v1164_v38  ;;  %1568 = vpow2.f32 %v1167_v35 }
 0x1fe   :  { %1570 = vlog2.f32 %v398_v8 }
 0x1ff   :  { %v1169_v47 = vmul.f32 1.442695, %v1166_v55 }
 0x201   :  { %1572 = vpow2.f32 %v1169_v47 }
 0x202   :  { %v341_v44 = vpop.xlane.xlu0 %340 }
 0x207   :  { %v1569_v2 = vpop.eup %1568 }
 0x208   :  { %1171 = vadd.xlane.f32.xlu1 %v1569_v2  ;;  %v1571_v63 = vpop.eup %1570 }
 0x209   :  { %v430_v17 = vmul.f32 0.6931472, %v1571_v63 }
 0x20b   :  { %v1573_v5 = vpop.eup %1572  ;;  %v446_v48 = vadd.f32 %v445_v7, %v430_v17 }
 0x20c   :  { %1173 = vadd.xlane.f32.xlu1 %v1573_v5 }
 0x210   :  { %349 = vadd.xlane.f32.xlu1 %v348_v11 }
 0x214   :  { %447 = vadd.xlane.f32.xlu1 %v446_v48 }
 0x216   :  { %v439_v55 = vpop.xlane.xlu0 %438 }
 0x295   :  { %v1172_v9 = vpop.xlane.xlu1 %1171 }
 0x296   :  { %1574 = vlog2.f32 %v1172_v9 }
 0x299   :  { %v1174_v24 = vpop.xlane.xlu1 %1173 }
 0x29a   :  { %1576 = vlog2.f32 %v1174_v24  ;;  %v1328_v24 = vpack.c.bf16 %v1861_v14, %v1871_v19  ;;  %v1335_v14 = vpack.c.bf16 %v1929_v6, %v1941_v20 }
 0x29c   :  { %280 = vst [vmem:[#allocation10] sm:$0xff] %v1328_v24  ;;  %287 = vst [vmem:[#allocation10 + $0x38] sm:$0xff] %v1335_v14 }
 0x29d   :  { %v350_v41 = vpop.xlane.xlu1 %349 }
 0x29e   :  { %v450_v53 = vmul.f32 0.0, %v350_v41 }
 0x2a0   :  { %v1575_v28 = vpop.eup %1574  ;;  %v453_v42 = vsel %vm451_vm1, %v450_v53, 0.0 }
 0x2a1   :  { %v1176_v26 = vmul.f32 0.6931472, %v1575_v28  ;;  %v448_v46 = vpop.xlane.xlu1 %447  ;;  %v1329_v28 = vpack.c.bf16 %v1865_v16, %v1877_v25 }
 0x2a2   :  { %v465_v47 = vmul.f32 0.0, %v448_v46 }
 0x2a3   :  { %v1179_v37 = vadd.f32 %v1176_v26, %v1162_v49  ;;  %v464_v49 = vmul.f32 %v1262_v33, %v439_v55  ;;  %v1330_v26 = vpack.c.bf16 %v1921_v61, %v1931_v10  ;;  %281 = vst [vmem:[#allocation10 + $0x8] sm:$0xff] %v1329_v28 }
 0x2a4   :  { %v1577_v31 = vpop.eup %1576  ;;  %v467_v36 = vsel %vm451_vm1, %v465_v47, 0.0 }
 0x2a5   :  { %v1178_v34 = vmul.f32 0.6931472, %v1577_v31  ;;  %v1181_v35 = vsub.f32 %v1179_v37, %v1948_v21  ;;  %v466_v52 = vsel %vm451_vm1, %v464_v49, 0.0  ;;  %v449_v21 = vmul.f32 %v1262_v33, %v341_v44  ;;  %282 = vst [vmem:[#allocation10 + $0x10] sm:$0xff] %v1330_v26 }
 0x2a6   :  { %v468_v45 = vadd.f32 %v467_v36, %v466_v52  ;;  %v1331_v37 = vpack.c.bf16 %v1925_v0, %v1937_v13  ;;  %v1332_v31 = vpack.c.bf16 %v1863_v15, %v1875_v23 }
 0x2a7   :  { %v1180_v54 = vadd.f32 %v1178_v34, %v1164_v38  ;;  %v1183_v8 = vmul.f32 %v1262_v33, %v1181_v35  ;;  %v452_v38 = vsel %vm451_vm1, %v449_v21, 0.0  ;;  %v1334_v33 = vpack.c.bf16 %v1923_v62, %v1935_v12 }
 0x2a8   :  { %v454_v43 = vadd.f32 %v453_v42, %v452_v38  ;;  %283 = vst [vmem:[#allocation10 + $0x18] sm:$0xff] %v1331_v37  ;;  %284 = vst [vmem:[#allocation10 + $0x20] sm:$0xff] %v1332_v31 }
 0x2a9   :  { %1187 = vrot.lane.b32.xlu0 %v1183_v8, %s1729_s3  ;;  %v1182_v39 = vsub.f32 %v1180_v54, %v1950_v30  ;;  %286 = vst [vmem:[#allocation10 + $0x30] sm:$0xff] %v1334_v33 }
 0x2ab   :  { %v1184_v40 = vmul.f32 0.0, %v1182_v39 }
 0x2ad   :  { %1189 = vrot.lane.b32.xlu1 %v1184_v40, %s1729_s3 }
 0x2c8   :  { %469 = vadd.xlane.f32.xlu0 %v468_v45 }
 0x2d1   :  { %455 = vadd.xlane.f32.xlu1 %v454_v43 }
 0x31b   :  { %v1188_v30 = vpop.permute.xlu0 %1187 }
 0x31c   :  { %v1193_v50 = vsel %vm451_vm1, %v1188_v30, 0.0 }
 0x31f   :  { %v1190_v3 = vpop.permute.xlu1 %1189 }
 0x320   :  { %v1194_v51 = vsel %vm451_vm1, %v1190_v3, 0.0 }
 0x321   :  { %v1195_v1 = vadd.f32 %v1194_v51, %v1193_v50 }
 0x323   :  { %1196 = vadd.xlane.f32.xlu0 %v1195_v1 }
 0x355   :  { %v470_v56 = vpop.xlane.xlu0 %469 }
 0x356   :  { %v471_v57 = vrot.slane %v470_v56, 4 }
 0x358   :  { %v472_v2 = vadd.f32 %v471_v57, %v470_v56 }
 0x35a   :  { %v473_v58 = vrot.slane %v472_v2, 2 }
 0x35c   :  { %v474_v4 = vadd.f32 %v473_v58, %v472_v2 }
 0x35e   :  { %v456_v59 = vpop.xlane.xlu1 %455  ;;  %v475_v11 = vrot.slane %v474_v4, 1 }
 0x35f   :  { %v457_v60 = vrot.slane %v456_v59, 4 }
 0x360   :  { %v476_v48 = vadd.f32 %v475_v11, %v474_v4 }
 0x361   :  { %v458_v63 = vadd.f32 %v457_v60, %v456_v59 }
 0x363   :  { %v459_v5 = vrot.slane %v458_v63, 2 }
 0x365   :  { %v460_v17 = vadd.f32 %v459_v5, %v458_v63 }
 0x367   :  { %v461_v7 = vrot.slane %v460_v17, 1 }
 0x369   :  { %v462_v9 = vadd.f32 %v461_v7, %v460_v17 }
 0x36b   :  { %1424 = vpush %v462_v9 }
 0x36c   :  { %1426 = vpush %v476_v48 }
 0x36d   :  { %1677 = shalt.err (!%p1674_p8)
}
 0x36e   :  { %s1678_s28 = scalar_lea.hbm %s2073_s5, 1024 }
 0x36f   :  { %p1679_p9 = scmp.ne.s32.totalorder %s2073_s5, %s1678_s28  ;;  %p1682_p10 = scmp.lt.u32.totalorder %s1678_s28, %s2073_s5 }
 0x371   :  { %p1684_p11 = pnand %p1682_p10, %p1679_p9 }
 0x373   :  { %1687 = shalt.err (!%p1684_p11)
}
 0x374   :  { %1232 = dma.vmem_to_hbm [thread:$0]  %s1227_s23, 1024, %s2073_s5, [#allocation4], %s1726_s2, %s1726_s2, %s1727_s1   ;;  %v1206_v61 = vand.u32 127, %v103_v22  ;;  %vm1207_vm2 = vcmp.eq.s32.totalorder %v1819_v27, 0 }
 0x375   :  { %s1731_s5 = smov [#allocation11]  }
 0x376   :  { %vm1212_vm3 = vcmp.eq.s32.totalorder %v1206_v61, 2  ;;  %vm1210_vm4 = vcmp.eq.s32.totalorder %v1206_v61, 1  ;;  %vm1208_vm5 = vcmp.eq.s32.totalorder %v1206_v61, 0  ;;  %s1239_s12 = sshll.u32 %s1731_s5, 4  ;;  %s1240_s12 = int_to_ptr.vmem [resolvable:$true] %s1239_s12 }
 0x377   :  { %vm1213_vm6 = vmand %vm1207_vm2, %vm1212_vm3  ;;  %s1688_s13 = scalar_lea.vmem %s1240_s12, 128  ;;  %p1693_p13 = scmp.lt.s32.totalorder %s1240_s12, %s1240_s12 }
 0x378   :  { %vm1211_vm7 = vmand %vm1207_vm2, %vm1210_vm4  ;;  %p1689_p12 = scmp.ne.s32.totalorder %s1240_s12, %s1688_s13  ;;  %p1694_p0 = scmp.lt.s32.totalorder %s1688_s13, %s1688_s13 }
 0x379   :  { %vm1209_vm8 = vmand %vm1207_vm2, %vm1208_vm5 }
 0x37a   :  { %p1695_p1 = por %p1694_p0, %p1693_p13 }
 0x37c   :  { %p1696_p2 = pnand %p1695_p1, %p1689_p12 }
 0x39c   :  { %s1425_s9 = spop %1424 }
 0x39d   :  { %s1427_s10 = spop %1426  ;;  %v1218_v10 = vstv %s1425_s9 }
 0x39e   :  { %v1216_v0 = vstv %s1427_s10 }
 0x3b0   :  { %v1197_v15 = vpop.xlane.xlu0 %1196 }
 0x3b1   :  { %v1198_v16 = vrot.slane %v1197_v15, 4 }
 0x3b3   :  { %v1199_v18 = vadd.f32 %v1198_v16, %v1197_v15 }
 0x3b5   :  { %v1200_v19 = vrot.slane %v1199_v18, 2 }
 0x3b7   :  { %v1201_v23 = vadd.f32 %v1200_v19, %v1199_v18 }
 0x3b9   :  { %v1202_v25 = vrot.slane %v1201_v23, 1 }
 0x3bb   :  { %v1203_v29 = vadd.f32 %v1202_v25, %v1201_v23 }
 0x3bd   :  { %1428 = vpush %v1203_v29 }
 0x3ee   :  { %s1429_s11 = spop %1428 }
 0x3ef   :  { %v1214_v62 = vstv %s1429_s11 }
 0x3f0   :  { %v1215_v6 = vsel %vm1213_vm6, %v1214_v62, 0.0 }
 0x3f1   :  { %v1217_v12 = vsel %vm1211_vm7, %v1216_v0, %v1215_v6 }
 0x3f2   :  { %v1219_v22 = vsel %vm1209_vm8, %v1218_v10, %v1217_v12 }
 0x3f3   :  { %1220 = vst [vmem:[#allocation11] sm:$0xff] %v1219_v22 }
 0x3f4   :  { %1699 = shalt.err (!%p1696_p2)
}
 0x3f5   :  { %s1700_s16 = scalar_lea.hbm %s2074_s6, 128 }
 0x3f6   :  { %p1701_p3 = scmp.ne.s32.totalorder %s2074_s6, %s1700_s16  ;;  %p1704_p4 = scmp.lt.u32.totalorder %s1700_s16, %s2074_s6 }
 0x3f8   :  { %p1706_p5 = pnand %p1704_p4, %p1701_p3 }
 0x3fa   :  { %1709 = shalt.err (!%p1706_p5)
}
 0x3fb   :  { %1242 = dma.vmem_to_hbm [thread:$0]  %s1240_s12, 128, %s2074_s6, [#allocation12]  }
 0x3fc   :  { %1716 = dma.done.wait [#allocation4], 1024  }
 0x3fd   :  { %1717 = vsyncadd [#allocation4], 4294966272 }
 0x3fe   :  { %1718 = dma.done.wait [#allocation12], 128  }
 0x3ff   :  { %1719 = vsyncadd [#allocation12], 4294967168 }
 0x400   :  { %1249 = vsyncpa [#allocation3], 1 }
 0x401   :  { %1250 = vsyncpa [#allocation6], 1 }
 0x402   :  { %1251 = vsyncpa [#allocation9], 1 }
 0x403   :  { %1252 = vsyncpa [#allocation4], 1 }
 0x404   :  { %1253 = vsyncpa [#allocation12], 1 }

// kernel: tpu_custom_call.1
= control target key start
LH: loop header
LB: loop body
LE: loop exit
PB: predicated region body
PF: predicated region fallthrough
CT: control target
= control target key end

     0   :  { %12 = vsyncpa [#allocation3], 0  ;;  %s2068_s0 = inlined_call_operand.hbm [shape: f32[1,1024], index: 0, kind: input, shape index: {}]   ;;  %s2069_s1 = inlined_call_operand.hbm [shape: f32[1,1024], index: 1, kind: input, shape index: {}]   ;;  %s2070_s2 = inlined_call_operand.hbm [shape: bf16[1024,128], index: 2, kind: input, shape index: {}]   ;;  %s2071_s3 = inlined_call_operand.vmem [shape: f32[1,128], index: 3, kind: input, shape index: {}]   ;;  %s2072_s4 = inlined_call_operand.hbm [shape: bf16[16,1024], index: 4, kind: input, shape index: {}]   ;;  %s2073_s5 = inlined_call_operand.hbm [shape: bf16[16,1024], index: 5, kind: output, shape index: {0}]   ;;  %s2074_s6 = inlined_call_operand.hbm [shape: f32[1,8,128], index: 6, kind: output, shape index: {1}]  }
   0x1   :  { %13 = vsyncpa [#allocation6], 0 }
   0x2   :  { %14 = vsyncpa [#allocation9], 0 }
   0x3   :  { %15 = vsyncpa [#allocation4], 0 }
   0x4   :  { %16 = vsyncpa [#allocation12], 0  ;;  %s1720_s21 = smov [#allocation5]   ;;  %s1721_s23 = smov [#allocation2]  }
   0x5   :  { %s33_s22 = sshll.u32 %s1720_s21, 4  ;;  %s23_s24 = sshll.u32 %s1721_s23, 4  ;;  %s34_s22 = int_to_ptr.vmem [resolvable:$true] %s33_s22  ;;  %s24_s24 = int_to_ptr.vmem [resolvable:$true] %s23_s24 }
   0x6   :  { %s1578_s27 = scalar_lea.hbm %s2069_s1, 128 }
   0x7   :  { %p1579_p0 = scmp.ne.s32.totalorder %s2069_s1, %s1578_s27  ;;  %p1582_p1 = scmp.lt.u32.totalorder %s1578_s27, %s2069_s1 }
   0x9   :  { %p1584_p2 = pnand %p1582_p1, %p1579_p0 }
   0xb   :  { %1587 = shalt.err (!%p1584_p2)
}
   0xc   :  { %s1588_s8 = scalar_lea.vmem %s34_s22, 128  ;;  %p1593_p4 = scmp.lt.s32.totalorder %s34_s22, %s34_s22 }
   0xd   :  { %p1589_p3 = scmp.ne.s32.totalorder %s34_s22, %s1588_s8  ;;  %p1594_p5 = scmp.lt.s32.totalorder %s1588_s8, %s1588_s8 }
   0xf   :  { %p1595_p6 = por %p1594_p5, %p1593_p4 }
  0x11   :  { %p1596_p7 = pnand %p1595_p6, %p1589_p3 }
  0x13   :  { %1599 = shalt.err (!%p1596_p7)
}
  0x14   :  { %36 = dma.hbm_to_vmem [thread:$0]  %s2069_s1, 128, %s34_s22, [#allocation6]  }
  0x15   :  { %s1600_s13 = scalar_lea.hbm %s2068_s0, 128 }
  0x16   :  { %p1601_p8 = scmp.ne.s32.totalorder %s2068_s0, %s1600_s13  ;;  %p1604_p9 = scmp.lt.u32.totalorder %s1600_s13, %s2068_s0 }
  0x18   :  { %p1606_p10 = pnand %p1604_p9, %p1601_p8 }
  0x1a   :  { %1609 = shalt.err (!%p1606_p10)
}
  0x1b   :  { %s1610_s18 = scalar_lea.vmem %s24_s24, 128  ;;  %p1615_p12 = scmp.lt.s32.totalorder %s24_s24, %s24_s24 }
  0x1c   :  { %p1611_p11 = scmp.ne.s32.totalorder %s24_s24, %s1610_s18  ;;  %p1616_p13 = scmp.lt.s32.totalorder %s1610_s18, %s1610_s18 }
  0x1e   :  { %p1617_p0 = por %p1616_p13, %p1615_p12 }
  0x20   :  { %p1618_p1 = pnand %p1617_p0, %p1611_p11 }
  0x22   :  { %1621 = shalt.err (!%p1618_p1)
}
  0x23   :  { %26 = dma.hbm_to_vmem [thread:$0]  %s2068_s0, 128, %s24_s24, [#allocation3]  }
  0x24   :  { %s1722_s20 = smov [#allocation7]   ;;  %s1622_s25 = scalar_lea.hbm %s2070_s2, 8192 }
  0x25   :  { %s42_s21 = sshll.u32 %s1722_s20, 4  ;;  %p1623_p2 = scmp.ne.s32.totalorder %s2070_s2, %s1622_s25  ;;  %s43_s21 = int_to_ptr.vmem [resolvable:$true] %s42_s21 }
  0x26   :  { %p1626_p3 = scmp.lt.u32.totalorder %s1622_s25, %s2070_s2 }
  0x28   :  { %p1628_p4 = pnand %p1626_p3, %p1623_p2 }
  0x2a   :  { %1631 = shalt.err (!%p1628_p4)
}
  0x2b   :  { %s1632_s30 = scalar_lea.vmem %s43_s21, 8192  ;;  %p1637_p6 = scmp.lt.s32.totalorder %s43_s21, %s43_s21 }
  0x2c   :  { %p1633_p5 = scmp.ne.s32.totalorder %s43_s21, %s1632_s30  ;;  %p1638_p7 = scmp.lt.s32.totalorder %s1632_s30, %s1632_s30 }
  0x2e   :  { %p1639_p8 = por %p1638_p7, %p1637_p6 }
  0x30   :  { %p1640_p9 = pnand %p1639_p8, %p1633_p5 }
  0x32   :  { %1643 = shalt.err (!%p1640_p9)
}
  0x33   :  { %s1723_s0 = smov 64   ;;  %s1724_s24 = smov 4  }
  0x34   :  { %48 = dma.hbm_to_vmem [thread:$0]  %s2070_s2, 8192, %s43_s21, [#allocation6], %s1723_s0, %s1723_s0, %s1724_s24  }
  0x35   :  { %s1725_s9 = smov [#allocation8]   ;;  %s1644_s13 = scalar_lea.hbm %s2072_s4, 1024 }
  0x36   :  { %s56_s10 = sshll.u32 %s1725_s9, 4  ;;  %p1645_p10 = scmp.ne.s32.totalorder %s2072_s4, %s1644_s13  ;;  %s57_s10 = int_to_ptr.vmem [resolvable:$true] %s56_s10 }
  0x37   :  { %p1648_p11 = scmp.lt.u32.totalorder %s1644_s13, %s2072_s4 }
  0x39   :  { %p1650_p12 = pnand %p1648_p11, %p1645_p10 }
  0x3b   :  { %1653 = shalt.err (!%p1650_p12)
}
  0x3c   :  { %s1654_s18 = scalar_lea.vmem %s57_s10, 1024  ;;  %p1659_p0 = scmp.lt.s32.totalorder %s57_s10, %s57_s10 }
  0x3d   :  { %p1655_p13 = scmp.ne.s32.totalorder %s57_s10, %s1654_s18  ;;  %p1660_p1 = scmp.lt.s32.totalorder %s1654_s18, %s1654_s18 }
  0x3f   :  { %p1661_p2 = por %p1660_p1, %p1659_p0 }
  0x41   :  { %p1662_p3 = pnand %p1661_p2, %p1655_p13 }
  0x43   :  { %1665 = shalt.err (!%p1662_p3)
}
  0x44   :  { %s1726_s2 = smov 512   ;;  %s1727_s1 = smov 32  }
  0x45   :  { %62 = dma.hbm_to_vmem [thread:$0]  %s2072_s4, 1024, %s57_s10, [#allocation9], %s1726_s2, %s1726_s2, %s1727_s1  }
  0x46   :  { %1710 = dma.done.wait [#allocation3], 128  }
  0x47   :  { %1711 = vsyncadd [#allocation3], 4294967168 }
  0x48   :  { %1712 = dma.done.wait [#allocation6], 8320  }
  0x49   :  { %1713 = vsyncadd [#allocation6], 4294958976 }
  0x4a   :  { %1714 = dma.done.wait [#allocation9], 1024  }
  0x4b   :  { %1715 = vsyncadd [#allocation9], 4294966272  ;;  %v1442_v0 = vld [vmem:[#allocation7 + $0x40] sm:$0xff]   ;;  %v1446_v4 = vld [vmem:[#allocation7 + $0x48] sm:$0xff]   ;;  %v103_v22 = vlaneseq  ;;  %vm451_vm1 = vcmask 7168   ;;  %s1730_s22 = smov [#allocation10]  }
  0x4c   :  { %v1443_v1 = vld [vmem:[#allocation7 + $0xc0] sm:$0xff]   ;;  %1336 = vmatprep.subr.bf16.mxu0 %v1442_v0  ;;  %v1447_v5 = vld [vmem:[#allocation7 + $0xc8] sm:$0xff]   ;;  %v1450_v8 = vld [vmem:[#allocation7 + $0x50] sm:$0xff]   ;;  %s1226_s23 = sshll.u32 %s1730_s22, 4  ;;  %s1227_s23 = int_to_ptr.vmem [resolvable:$true] %s1226_s23 }
  0x4d   :  { %v1444_v2 = vld [vmem:[#allocation7] sm:$0xff]   ;;  %1358 = vmatprep.subr.bf16.mxu1 %v1443_v1  ;;  %v1448_v6 = vld [vmem:[#allocation7 + $0x8] sm:$0xff]   ;;  %v1451_v9 = vld [vmem:[#allocation7 + $0xd0] sm:$0xff]   ;;  %v1819_v27 = vshrl.u32 %v103_v22, 7  ;;  %s1666_s25 = scalar_lea.vmem %s1227_s23, 1024  ;;  %p1671_p5 = scmp.lt.s32.totalorder %s1227_s23, %s1227_s23 }
  0x4e   :  { %v1445_v3 = vld [vmem:[#allocation7 + $0x80] sm:$0xff]   ;;  %1337 = vmatpush3.bf16.msra.mxu0 %v1444_v2  ;;  %v1449_v7 = vld [vmem:[#allocation7 + $0x88] sm:$0xff]   ;;  %v1452_v10 = vld [vmem:[#allocation7 + $0x10] sm:$0xff]   ;;  %p1667_p4 = scmp.ne.s32.totalorder %s1227_s23, %s1666_s25  ;;  %p1672_p6 = scmp.lt.s32.totalorder %s1666_s25, %s1666_s25 }
  0x4f   :  { %1359 = vmatpush3.bf16.msra.mxu1 %v1445_v3  ;;  %1338 = vmatprep.subr.bf16.mxu0 %v1446_v4  ;;  %v1453_v11 = vld [vmem:[#allocation7 + $0x90] sm:$0xff]   ;;  %v1454_v12 = vld [vmem:[#allocation7 + $0x58] sm:$0xff]   ;;  %v1458_v16 = vld [vmem:[#allocation7 + $0x60] sm:$0xff]   ;;  %v109_v32 = vsub.s32 1, %v1819_v27  ;;  %v117_v35 = vsub.s32 3, %v1819_v27  ;;  %v105_v39 = vsub.s32 0, %v1819_v27 }
  0x50   :  { %1360 = vmatprep.subr.bf16.mxu1 %v1447_v5  ;;  %v1455_v13 = vld [vmem:[#allocation7 + $0xd8] sm:$0xff]   ;;  %v1459_v17 = vld [vmem:[#allocation7 + $0xe0] sm:$0xff]   ;;  %v1462_v20 = vld [vmem:[#allocation7 + $0x68] sm:$0xff]   ;;  %v113_v40 = vsub.s32 2, %v1819_v27  ;;  %vm295_vm0 = vcmp.lt.s32.totalorder %v1819_v27, 2  ;;  %p1673_p7 = por %p1672_p6, %p1671_p5 }
  0x51   :  { %v1456_v14 = vld [vmem:[#allocation7 + $0x18] sm:$0xff]   ;;  %v1460_v18 = vld [vmem:[#allocation7 + $0x20] sm:$0xff]   ;;  %v1463_v21 = vld [vmem:[#allocation7 + $0xe8] sm:$0xff]  }
  0x52   :  { %1339 = vmatpush3.bf16.msra.mxu0 %v1448_v6  ;;  %v1457_v15 = vld [vmem:[#allocation7 + $0x98] sm:$0xff]   ;;  %v1461_v19 = vld [vmem:[#allocation7 + $0xa0] sm:$0xff]   ;;  %v1464_v23 = vld [vmem:[#allocation7 + $0x28] sm:$0xff]   ;;  %p1674_p8 = pnand %p1673_p7, %p1667_p4 }
  0x53   :  { %1361 = vmatpush3.bf16.msra.mxu1 %v1449_v7  ;;  %1340 = vmatprep.subr.bf16.mxu0 %v1450_v8  ;;  %v1465_v24 = vld [vmem:[#allocation7 + $0xa8] sm:$0xff]   ;;  %v1466_v25 = vld [vmem:[#allocation7 + $0x70] sm:$0xff]   ;;  %v1470_v30 = vld [vmem:[#allocation7 + $0x78] sm:$0xff]  }
  0x54   :  { %1362 = vmatprep.subr.bf16.mxu1 %v1451_v9  ;;  %v1467_v26 = vld [vmem:[#allocation7 + $0xf0] sm:$0xff]   ;;  %v1471_v31 = vld [vmem:[#allocation7 + $0xf8] sm:$0xff]   ;;  %v78_v38 = vld [vmem:[#allocation8] sm:$0xff] }
  0x55   :  { %v1468_v28 = vld [vmem:[#allocation7 + $0x30] sm:$0xff]   ;;  %v1472_v33 = vld [vmem:[#allocation7 + $0x38] sm:$0xff]   ;;  %v82_v41 = vld [vmem:[#allocation8 + $0x20] sm:$0xff]  ;;  %v1829_v42 = vunpack.c.l.bf16 %v78_v38  ;;  %v1831_v43 = vunpack.c.h.bf16 %v78_v38 }
  0x56   :  { %1341 = vmatpush3.bf16.msra.mxu0 %v1452_v10  ;;  %v1469_v29 = vld [vmem:[#allocation7 + $0xb0] sm:$0xff]   ;;  %v1473_v34 = vld [vmem:[#allocation7 + $0xb8] sm:$0xff]   ;;  %v79_v46 = vld [vmem:[#allocation8 + $0x8] sm:$0xff]  ;;  %v1835_v48 = vunpack.c.l.bf16 %v82_v41  ;;  %v1837_v49 = vunpack.c.h.bf16 %v82_v41  ;;  %v121_v41 = vsub.s32 4, %v1819_v27 }
  0x57   :  { %1363 = vmatpush3.bf16.msra.mxu1 %v1453_v11  ;;  %1342 = vmatprep.subr.bf16.mxu0 %v1454_v12  ;;  %v1823_v36 = vld [vmem:[#allocation2] sm:$0xff]  ;;  %v1825_v37 = vld [vmem:[#allocation5] sm:$0xff]  ;;  %v83_v47 = vld [vmem:[#allocation8 + $0x28] sm:$0xff]  ;;  %v1839_v50 = vunpack.c.l.bf16 %v79_v46  ;;  %v1841_v51 = vunpack.c.h.bf16 %v79_v46 }
  0x58   :  { %1364 = vmatprep.subr.bf16.mxu1 %v1455_v13  ;;  %v110_v44 = vrot.slane %v1825_v37, %v109_v32  ;;  %v167_v45 = vrot.slane %v1823_v36, %v109_v32  ;;  %v1474_v52 = vld [vmem:[#allocation7 + $0x140] sm:$0xff]   ;;  %v1844_v54 = vunpack.c.l.bf16 %v83_v47  ;;  %v1846_v55 = vunpack.c.h.bf16 %v83_v47  ;;  %v1480_v32 = vld [vmem:[#allocation7 + $0x108] sm:$0xff]   ;;  %v1483_v38 = vld [vmem:[#allocation7 + $0x1d0] sm:$0xff]  }
  0x59   :  { %v118_v56 = vrot.slane %v1825_v37, %v117_v35  ;;  %v1475_v57 = vld [vmem:[#allocation7 + $0x1c0] sm:$0xff]   ;;  %v175_v59 = vrot.slane %v1823_v36, %v117_v35  ;;  %v106_v60 = vrot.slane %v1825_v37, %v105_v39  ;;  %v163_v61 = vrot.slane %v1823_v36, %v105_v39  ;;  %v1486_v46 = vld [vmem:[#allocation7 + $0x158] sm:$0xff]  }
  0x5a   :  { %1343 = vmatpush3.bf16.msra.mxu0 %v1456_v14  ;;  %v144_v53 = vmul.f32 %v110_v44, %v1831_v43  ;;  %v152_v58 = vmul.f32 %v110_v44, %v1837_v49  ;;  %v114_v1 = vrot.slane %v1825_v37, %v113_v40  ;;  %v171_v5 = vrot.slane %v1823_v36, %v113_v40  ;;  %v1484_v40 = vld [vmem:[#allocation7 + $0x110] sm:$0xff]   ;;  %v1487_v47 = vld [vmem:[#allocation7 + $0x1d8] sm:$0xff]  }
  0x5b   :  { %1365 = vmatpush3.bf16.msra.mxu1 %v1457_v15  ;;  %1344 = vmatprep.subr.bf16.mxu0 %v1458_v16  ;;  %v146_v63 = vmul.f32 %v118_v56, %v1841_v51  ;;  %v154_v0 = vmul.f32 %v118_v56, %v1846_v55  ;;  %v143_v3 = vmul.f32 %v106_v60, %v1829_v42  ;;  %v125_v35 = vsub.s32 5, %v1819_v27  ;;  %v1485_v44 = vld [vmem:[#allocation7 + $0x190] sm:$0xff]  }
  0x5c   :  { %1366 = vmatprep.subr.bf16.mxu1 %v1459_v17  ;;  %v201_v62 = vadd.f32 %v167_v45, %v144_v53  ;;  %v209_v2 = vadd.f32 %v167_v45, %v152_v58  ;;  %v151_v4 = vmul.f32 %v106_v60, %v1835_v48  ;;  %v145_v8 = vmul.f32 %v114_v1, %v1839_v50  ;;  %v84_v58 = vld [vmem:[#allocation8 + $0x30] sm:$0xff]  ;;  %v81_v60 = vld [vmem:[#allocation8 + $0x18] sm:$0xff] }
  0x5d   :  { %v203_v6 = vadd.f32 %v175_v59, %v146_v63  ;;  %v211_v7 = vadd.f32 %v175_v59, %v154_v0  ;;  %v200_v9 = vadd.f32 %v163_v61, %v143_v3  ;;  %v153_v11 = vmul.f32 %v114_v1, %v1844_v54  ;;  %v1490_v0 = vld [vmem:[#allocation7 + $0x160] sm:$0xff]  }
  0x5e   :  { %1345 = vmatpush3.bf16.msra.mxu0 %v1460_v18  ;;  %1506 = vtanh.f32 %v201_v62  ;;  %v208_v10 = vadd.f32 %v163_v61, %v151_v4  ;;  %v202_v12 = vadd.f32 %v171_v5, %v145_v8  ;;  %v133_v39 = vsub.s32 7, %v1819_v27 }
  0x5f   :  { %1367 = vmatpush3.bf16.msra.mxu1 %v1461_v19  ;;  %1346 = vmatprep.subr.bf16.mxu0 %v1462_v20  ;;  %1508 = vtanh.f32 %v209_v2  ;;  %v210_v13 = vadd.f32 %v171_v5, %v153_v11  ;;  %v129_v45 = vsub.s32 6, %v1819_v27  ;;  %v126_v53 = vrot.slane %v1825_v37, %v125_v35  ;;  %v85_v5 = vld [vmem:[#allocation8 + $0x38] sm:$0xff] }
  0x60   :  { %1368 = vmatprep.subr.bf16.mxu1 %v1463_v21  ;;  %1510 = vtanh.f32 %v203_v6  ;;  %v1476_v21 = vld [vmem:[#allocation7 + $0x100] sm:$0xff]   ;;  %v122_v56 = vrot.slane %v1825_v37, %v121_v41  ;;  %v183_v59 = vrot.slane %v1823_v36, %v125_v35  ;;  %v134_v61 = vrot.slane %v1825_v37, %v133_v39  ;;  %v1489_v6 = vld [vmem:[#allocation7 + $0x198] sm:$0xff]  }
  0x61   :  { %1512 = vtanh.f32 %v211_v7  ;;  %v191_v62 = vrot.slane %v1823_v36, %v133_v39  ;;  %v130_v63 = vrot.slane %v1825_v37, %v129_v45  ;;  %v1899_v3 = vunpack.c.l.bf16 %v84_v58 }
  0x62   :  { %1347 = vmatpush3.bf16.msra.mxu0 %v1464_v23  ;;  %1514 = vtanh.f32 %v200_v9  ;;  %v1901_v4 = vunpack.c.h.bf16 %v84_v58  ;;  %v1903_v7 = vunpack.c.l.bf16 %v81_v60  ;;  %v1905_v8 = vunpack.c.h.bf16 %v81_v60  ;;  %v1501_v58 = vld [vmem:[#allocation7 + $0x1b0] sm:$0xff]   ;;  %v1504_v60 = vld [vmem:[#allocation7 + $0x138] sm:$0xff]  }
  0x63   :  { %1369 = vmatpush3.bf16.msra.mxu1 %v1465_v24  ;;  %1348 = vmatprep.subr.bf16.mxu0 %v1466_v25  ;;  %1516 = vtanh.f32 %v208_v10  ;;  %v1477_v24 = vld [vmem:[#allocation7 + $0x180] sm:$0xff]   ;;  %v1907_v9 = vunpack.c.l.bf16 %v85_v5  ;;  %v1909_v37 = vunpack.c.h.bf16 %v85_v5 }
  0x64   :  { %1370 = vmatprep.subr.bf16.mxu1 %v1467_v26  ;;  %1518 = vtanh.f32 %v202_v12  ;;  %v1491_v10 = vld [vmem:[#allocation7 + $0x1e0] sm:$0xff]   ;;  %v156_v12 = vmul.f32 %v126_v53, %v1901_v4 }
  0x65   :  { %1520 = vtanh.f32 %v210_v13  ;;  %v157_v39 = vmul.f32 %v130_v63, %v1907_v9 }
  0x66   :  { %1349 = vmatpush3.bf16.msra.mxu0 %v1468_v28  ;;  %v1478_v28 = vld [vmem:[#allocation7 + $0x148] sm:$0xff]  }
  0x67   :  { %1371 = vmatpush3.bf16.msra.mxu1 %v1469_v29  ;;  %1350 = vmatprep.subr.bf16.mxu0 %v1470_v30  ;;  %v1479_v30 = vld [vmem:[#allocation7 + $0x1c8] sm:$0xff]  }
  0x68   :  { %1372 = vmatprep.subr.bf16.mxu1 %v1471_v31  ;;  %v1861_v14 = vpop.eup %1506 }
  0x69   :  { %v1863_v15 = vpop.eup %1508 }
  0x6a   :  { %1351 = vmatpush3.bf16.msra.mxu0 %v1472_v33  ;;  %v1865_v16 = vpop.eup %1510  ;;  %v233_v17 = vpack.c.bf16 %v1863_v15, %v1861_v14  ;;  %v1481_v33 = vld [vmem:[#allocation7 + $0x188] sm:$0xff]  }
  0x6b   :  { %1373 = vmatpush3.bf16.msra.mxu1 %v1473_v34  ;;  %1380 = vmatprep.subr.bf16.mxu0 %v1474_v52  ;;  %v1869_v18 = vpop.eup %1512  ;;  %v1482_v34 = vld [vmem:[#allocation7 + $0x150] sm:$0xff]   ;;  %v1488_v52 = vld [vmem:[#allocation7 + $0x118] sm:$0xff]  }
  0x6c   :  { %1402 = vmatprep.subr.bf16.mxu1 %v1475_v57  ;;  %v1871_v19 = vpop.eup %1514  ;;  %1029 = vmatprep.mubr.bf16.mxu0 %v233_v17  ;;  %v235_v20 = vpack.c.bf16 %v1869_v18, %v1865_v16  ;;  %v80_v57 = vld [vmem:[#allocation8 + $0x10] sm:$0xff]  ;;  %v179_v17 = vrot.slane %v1823_v36, %v121_v41 }
  0x6d   :  { %v1875_v23 = vpop.eup %1516  ;;  %v1895_v1 = vunpack.c.l.bf16 %v80_v57  ;;  %v1897_v2 = vunpack.c.h.bf16 %v80_v57  ;;  %v1502_v57 = vld [vmem:[#allocation7 + $0x178] sm:$0xff]  }
  0x6e   :  { %v1877_v25 = vpop.eup %1518  ;;  %1070 = vmatprep.mubr.bf16.mxu1 %v235_v20  ;;  %v232_v26 = vpack.c.bf16 %v1875_v23, %v1871_v19  ;;  %v1492_v20 = vld [vmem:[#allocation7 + $0x120] sm:$0xff]  }
  0x6f   :  { %v1881_v29 = vpop.eup %1520  ;;  %v148_v11 = vmul.f32 %v126_v53, %v1897_v2  ;;  %v147_v13 = vmul.f32 %v122_v56, %v1895_v1  ;;  %v1499_v53 = vld [vmem:[#allocation7 + $0x1f0] sm:$0xff]  }
  0x70   :  { %1030 = vmatmul.mubr.bf16.vlgmr.msra.gmra.mrb[0].mxu0 %v232_v26  ;;  %v234_v31 = vpack.c.bf16 %v1881_v29, %v1877_v25  ;;  %v155_v26 = vmul.f32 %v122_v56, %v1899_v3  ;;  %v1500_v56 = vld [vmem:[#allocation7 + $0x130] sm:$0xff]  }
  0x71   :  { %1381 = vmatpush3.bf16.msra.mxu0 %v1476_v21  ;;  %v150_v21 = vmul.f32 %v134_v61, %v1905_v8  ;;  %v204_v41 = vadd.f32 %v179_v17, %v147_v13 }
  0x72   :  { %1071 = vmatmul.mubr.bf16.vlgmr.msra.gmra.mrb[0].mxu1 %v234_v31  ;;  %1382 = vmatprep.subr.bf16.mxu0 %v1478_v28  ;;  %v1494_v28 = vld [vmem:[#allocation7 + $0x168] sm:$0xff]   ;;  %v213_v31 = vadd.f32 %v183_v59, %v156_v12 }
  0x73   :  { %1403 = vmatpush3.bf16.msra.mxu1 %v1477_v24  ;;  %v158_v24 = vmul.f32 %v134_v61, %v1909_v37  ;;  %v207_v35 = vadd.f32 %v191_v62, %v150_v21 }
  0x74   :  { %1404 = vmatprep.subr.bf16.mxu1 %v1479_v30  ;;  %v205_v30 = vadd.f32 %v183_v59, %v148_v11  ;;  %v1503_v59 = vld [vmem:[#allocation7 + $0x1f8] sm:$0xff]  }
  0x75   :  { %1383 = vmatpush3.bf16.msra.mxu0 %v1480_v32  ;;  %v149_v32 = vmul.f32 %v130_v63, %v1903_v7  ;;  %v1505_v63 = vld [vmem:[#allocation7 + $0x1b8] sm:$0xff]  }
  0x76   :  { %1384 = vmatprep.subr.bf16.mxu0 %v1482_v34  ;;  %v1493_v34 = vld [vmem:[#allocation7 + $0x1a0] sm:$0xff]   ;;  %1522 = vtanh.f32 %v205_v30 }
  0x77   :  { %1405 = vmatpush3.bf16.msra.mxu1 %v1481_v33  ;;  %v187_v33 = vrot.slane %v1823_v36, %v129_v45  ;;  %1524 = vtanh.f32 %v213_v31  ;;  %v1497_v36 = vld [vmem:[#allocation7 + $0x1a8] sm:$0xff]  }
  0x78   :  { %1406 = vmatprep.subr.bf16.mxu1 %v1483_v38  ;;  %v215_v38 = vadd.f32 %v191_v62, %v158_v24  ;;  %1526 = vtanh.f32 %v207_v35 }
  0x79   :  { %1385 = vmatpush3.bf16.msra.mxu0 %v1484_v40  ;;  %v1495_v40 = vld [vmem:[#allocation7 + $0x1e8] sm:$0xff]   ;;  %v214_v45 = vadd.f32 %v187_v33, %v157_v39 }
  0x7a   :  { %1386 = vmatprep.subr.bf16.mxu0 %v1486_v46  ;;  %v212_v46 = vadd.f32 %v179_v17, %v155_v26  ;;  %1528 = vtanh.f32 %v215_v38  ;;  %v1263_v26 = vld [vmem:[%s2071_s3] ss:$0 sm:$0xff]  ;;  %s1729_s3 = smov 125  }
  0x7b   :  { %1407 = vmatpush3.bf16.msra.mxu1 %v1485_v44  ;;  %v1496_v44 = vld [vmem:[#allocation7 + $0x128] sm:$0xff]   ;;  %1530 = vtanh.f32 %v204_v41 }
  0x7c   :  { %1408 = vmatprep.subr.bf16.mxu1 %v1487_v47  ;;  %v1498_v47 = vld [vmem:[#allocation7 + $0x170] sm:$0xff]   ;;  %1532 = vtanh.f32 %v212_v46 }
  0x7d   :  { %1387 = vmatpush3.bf16.msra.mxu0 %v1488_v52  ;;  %v206_v52 = vadd.f32 %v187_v33, %v149_v32 }
  0x7e   :  { %1388 = vmatprep.subr.bf16.mxu0 %v1490_v0 }
  0x7f   :  { %1409 = vmatpush3.bf16.msra.mxu1 %v1489_v6  ;;  %1534 = vtanh.f32 %v206_v52 }
  0x80   :  { %1410 = vmatprep.subr.bf16.mxu1 %v1491_v10  ;;  %1536 = vtanh.f32 %v214_v45  ;;  %v1921_v61 = vpop.eup %1522 }
  0x81   :  { %1389 = vmatpush3.bf16.msra.mxu0 %v1492_v20  ;;  %v1923_v62 = vpop.eup %1524 }
  0x82   :  { %1390 = vmatprep.subr.bf16.mxu0 %v1494_v28  ;;  %v1925_v0 = vpop.eup %1526  ;;  %v237_v5 = vpack.c.bf16 %v1923_v62, %v1921_v61 }
  0x83   :  { %1411 = vmatpush3.bf16.msra.mxu1 %v1493_v34 }
  0x84   :  { %1412 = vmatprep.subr.bf16.mxu1 %v1495_v40  ;;  %v1929_v6 = vpop.eup %1528  ;;  %1111 = vmatprep.mubr.bf16.mxu0 %v237_v5 }
  0x85   :  { %1391 = vmatpush3.bf16.msra.mxu0 %v1496_v44  ;;  %v1931_v10 = vpop.eup %1530  ;;  %v239_v11 = vpack.c.bf16 %v1929_v6, %v1925_v0 }
  0x86   :  { %1392 = vmatprep.subr.bf16.mxu0 %v1498_v47  ;;  %v1935_v12 = vpop.eup %1532 }
  0x87   :  { %1413 = vmatpush3.bf16.msra.mxu1 %v1497_v36  ;;  %1152 = vmatprep.mubr.bf16.mxu1 %v239_v11  ;;  %v236_v17 = vpack.c.bf16 %v1935_v12, %v1931_v10 }
  0x88   :  { %1414 = vmatprep.subr.bf16.mxu1 %v1499_v53 }
  0x89   :  { %1393 = vmatpush3.bf16.msra.mxu0 %v1500_v56  ;;  %v1937_v13 = vpop.eup %1534 }
  0x8a   :  { %1394 = vmatprep.subr.bf16.mxu0 %v1502_v57  ;;  %v1941_v20 = vpop.eup %1536 }
  0x8b   :  { %1415 = vmatpush3.bf16.msra.mxu1 %v1501_v58  ;;  %v238_v21 = vpack.c.bf16 %v1941_v20, %v1937_v13 }
  0x8c   :  { %1416 = vmatprep.subr.bf16.mxu1 %v1503_v59 }
  0x8d   :  { %1395 = vmatpush3.bf16.msra.mxu0 %v1504_v60 }
  0x8f   :  { %1417 = vmatpush3.bf16.msra.mxu1 %v1505_v63 }
  0x90   :  { %1112 = vmatmul.mubr.bf16.vlgmr.msra.gmra.mrb[4].mxu0 %v236_v17 }
  0x92   :  { %1153 = vmatmul.mubr.bf16.vlgmr.msra.gmra.mrb[4].mxu1 %v238_v21 }
 0x143   :  { %v1352_v24 = vpop.f32.mrb[0].mxu0 }
 0x144   :  { %v1353_v28 = vpop.f32.mrb[1].mxu0 }
 0x145   :  { %v1374_v30 = vpop.f32.mrb[0].mxu1  ;;  %v1354_v31 = vadd.f32 %v1353_v28, %v1352_v24  ;;  %v1355_v32 = vpop.f32.mrb[2].mxu0 }
 0x146   :  { %v1375_v33 = vpop.f32.mrb[1].mxu1  ;;  %v1356_v34 = vpop.f32.mrb[3].mxu0 }
 0x147   :  { %v1032_v35 = vadd.f32 %v1354_v31, %v1263_v26  ;;  %v1376_v38 = vadd.f32 %v1375_v33, %v1374_v30  ;;  %v1377_v39 = vpop.f32.mrb[2].mxu1  ;;  %v1357_v40 = vadd.f32 %v1356_v34, %v1355_v32  ;;  %v302_v31 = vmul.f32 0.5, %v1831_v43 }
 0x148   :  { %v1378_v41 = vpop.f32.mrb[3].mxu1  ;;  %v303_v32 = vmul.f32 0.5, %v1839_v50  ;;  %v304_v33 = vmul.f32 0.5, %v1841_v51  ;;  %v305_v34 = vmul.f32 0.5, %v1895_v1 }
 0x149   :  { %v1073_v44 = vadd.f32 %v1376_v38, %v1032_v35  ;;  %v1035_v46 = vadd.f32 %v1357_v40, %v1263_v26  ;;  %v1379_v47 = vadd.f32 %v1378_v41, %v1377_v39  ;;  %v301_v26 = vmul.f32 0.5, %v1829_v42 }
 0x14a   :  { %v318_v38 = vmul.f32 %v302_v31, %v1831_v43  ;;  %v319_v39 = vmul.f32 %v303_v32, %v1839_v50  ;;  %v306_v40 = vmul.f32 0.5, %v1897_v2  ;;  %v320_v41 = vmul.f32 %v304_v33, %v1841_v51 }
 0x14b   :  { %v1076_v52 = vadd.f32 %v1379_v47, %v1035_v46  ;;  %v317_v35 = vmul.f32 %v301_v26, %v1829_v42  ;;  %v307_v46 = vmul.f32 0.5, %v1903_v7  ;;  %v321_v47 = vmul.f32 %v305_v34, %v1895_v1 }
 0x14c   :  { %v351_v42 = vmul.f32 %v1871_v19, %v1871_v19  ;;  %v352_v43 = vmul.f32 %v1861_v14, %v1861_v14  ;;  %v353_v50 = vmul.f32 %v1877_v25, %v1877_v25  ;;  %v354_v51 = vmul.f32 %v1865_v16, %v1865_v16 }
 0x14d   :  { %v323_v1 = vmul.f32 %v307_v46, %v1903_v7  ;;  %v358_v7 = vmul.f32 %v1925_v0, %v1925_v0 }
 0x163   :  { %v1396_v36 = vpop.f32.mrb[4].mxu0 }
 0x164   :  { %v1397_v45 = vpop.f32.mrb[5].mxu0 }
 0x165   :  { %v1418_v53 = vpop.f32.mrb[4].mxu1  ;;  %v1398_v56 = vadd.f32 %v1397_v45, %v1396_v36  ;;  %v1399_v57 = vpop.f32.mrb[6].mxu0  ;;  %v308_v36 = vmul.f32 0.5, %v1905_v8  ;;  %v322_v45 = vmul.f32 %v306_v40, %v1897_v2  ;;  %v356_v2 = vmul.f32 %v1921_v61, %v1921_v61 }
 0x166   :  { %v1419_v58 = vpop.f32.mrb[5].mxu1  ;;  %v1400_v59 = vpop.f32.mrb[7].mxu0 }
 0x167   :  { %v1114_v60 = vadd.f32 %v1398_v56, %v1073_v44  ;;  %v1420_v63 = vadd.f32 %v1419_v58, %v1418_v53  ;;  %v1421_v5 = vpop.f32.mrb[6].mxu1  ;;  %v1401_v11 = vadd.f32 %v1400_v59, %v1399_v57  ;;  %v333_v44 = vadd.f32 %v318_v38, %v317_v35 }
 0x168   :  { %v1422_v17 = vpop.f32.mrb[7].mxu1  ;;  %v355_v57 = vmul.f32 %v1931_v10, %v1931_v10  ;;  %v324_v58 = vmul.f32 %v308_v36, %v1905_v8  ;;  %v367_v59 = vsub.f32 1.0, %v351_v42  ;;  %v372_v26 = vsub.f32 1.0, %v356_v2 }
 0x169   :  { %v1948_v21 = vadd.f32 %v1420_v63, %v1114_v60  ;;  %v1117_v24 = vadd.f32 %v1401_v11, %v1076_v52  ;;  %v1423_v28 = vadd.f32 %v1422_v17, %v1421_v5  ;;  %v334_v52 = vadd.f32 %v333_v44, %v319_v39 }
 0x16a   :  { %v368_v60 = vsub.f32 1.0, %v352_v43  ;;  %v357_v5 = vmul.f32 %v1937_v13, %v1937_v13  ;;  %v369_v11 = vsub.f32 1.0, %v353_v50  ;;  %v370_v17 = vsub.f32 1.0, %v354_v51 }
 0x16b   :  { %v1950_v30 = vadd.f32 %v1423_v28, %v1117_v24  ;;  %1161 = vmax.xlane.f32.xlu0 %v1948_v21  ;;  %v335_v53 = vadd.f32 %v334_v52, %v320_v41  ;;  %v371_v24 = vsub.f32 1.0, %v355_v57  ;;  %v383_v31 = vadd.f32 1e-08, %v367_v59 }
 0x16c   :  { %v384_v32 = vadd.f32 1e-08, %v368_v60  ;;  %v385_v33 = vadd.f32 1e-08, %v369_v11  ;;  %v373_v35 = vsub.f32 1.0, %v357_v5  ;;  %v374_v39 = vsub.f32 1.0, %v358_v7 }
 0x16d   :  { %v336_v56 = vadd.f32 %v335_v53, %v321_v47  ;;  %v386_v8 = vadd.f32 1e-08, %v370_v17  ;;  %v387_v38 = vadd.f32 1e-08, %v371_v24  ;;  %1538 = vlog2.f32 %v383_v31 }
 0x16e   :  { %v388_v40 = vadd.f32 1e-08, %v372_v26  ;;  %1540 = vlog2.f32 %v384_v32  ;;  %v389_v41 = vadd.f32 1e-08, %v373_v35  ;;  %v390_v44 = vadd.f32 1e-08, %v374_v39 }
 0x16f   :  { %1163 = vmax.xlane.f32.xlu0 %v1950_v30  ;;  %v337_v63 = vadd.f32 %v336_v56, %v322_v45  ;;  %1542 = vlog2.f32 %v385_v33  ;;  %v360_v26 = vmul.f32 %v1863_v15, %v1863_v15  ;;  %v361_v32 = vmul.f32 %v1881_v29, %v1881_v29 }
 0x170   :  { %1544 = vlog2.f32 %v386_v8  ;;  %v362_v35 = vmul.f32 %v1869_v18, %v1869_v18  ;;  %v363_v39 = vmul.f32 %v1935_v12, %v1935_v12 }
 0x171   :  { %v338_v28 = vadd.f32 %v337_v63, %v323_v1  ;;  %1546 = vlog2.f32 %v387_v38  ;;  %v376_v33 = vsub.f32 1.0, %v360_v26  ;;  %v377_v8 = vsub.f32 1.0, %v361_v32 }
 0x172   :  { %1548 = vlog2.f32 %v388_v40  ;;  %v378_v40 = vsub.f32 1.0, %v362_v35 }
 0x173   :  { %v339_v34 = vadd.f32 %v338_v28, %v324_v58  ;;  %1550 = vlog2.f32 %v389_v41  ;;  %v359_v28 = vmul.f32 %v1875_v23, %v1875_v23  ;;  %v392_v38 = vadd.f32 1e-08, %v376_v33 }
 0x174   :  { %1552 = vlog2.f32 %v390_v44  ;;  %v393_v41 = vadd.f32 1e-08, %v377_v8  ;;  %v364_v44 = vmul.f32 %v1923_v62, %v1923_v62 }
 0x175   :  { %340 = vadd.xlane.f32.xlu0 %v339_v34  ;;  %v375_v31 = vsub.f32 1.0, %v359_v28 }
 0x177   :  { %v1539_v46 = vpop.eup %1538  ;;  %v391_v34 = vadd.f32 1e-08, %v375_v31 }
 0x178   :  { %v1541_v47 = vpop.eup %1540  ;;  %v400_v52 = vmul.f32 0.6931472, %v1539_v46  ;;  %v379_v46 = vsub.f32 1.0, %v363_v39 }
 0x179   :  { %v1543_v36 = vpop.eup %1542  ;;  %v402_v45 = vmul.f32 0.6931472, %v1541_v47  ;;  %1554 = vlog2.f32 %v391_v34  ;;  %v394_v47 = vadd.f32 1e-08, %v378_v40 }
 0x17a   :  { %v1545_v53 = vpop.eup %1544  ;;  %v404_v42 = vmul.f32 0.6931472, %v1543_v36  ;;  %1556 = vlog2.f32 %v392_v38  ;;  %v310_v36 = vmul.f32 0.5, %v1837_v49 }
 0x17b   :  { %v1547_v43 = vpop.eup %1546  ;;  %v406_v50 = vmul.f32 0.6931472, %v1545_v53  ;;  %v431_v51 = vadd.f32 %v402_v45, %v400_v52  ;;  %1558 = vlog2.f32 %v393_v41  ;;  %v309_v52 = vmul.f32 0.5, %v1835_v48 }
 0x17c   :  { %v1549_v1 = vpop.eup %1548  ;;  %v408_v56 = vmul.f32 0.6931472, %v1547_v43  ;;  %v365_v45 = vmul.f32 %v1941_v20, %v1941_v20  ;;  %v380_v53 = vsub.f32 1.0, %v364_v44  ;;  %1560 = vlog2.f32 %v394_v47 }
 0x17d   :  { %v432_v57 = vadd.f32 %v431_v51, %v404_v42  ;;  %v1551_v2 = vpop.eup %1550  ;;  %v410_v58 = vmul.f32 0.6931472, %v1549_v1  ;;  %v395_v42 = vadd.f32 1e-08, %v379_v46  ;;  %v325_v51 = vmul.f32 %v309_v52, %v1835_v48 }
 0x17e   :  { %v1553_v60 = vpop.eup %1552  ;;  %v412_v63 = vmul.f32 0.6931472, %v1551_v2  ;;  %v326_v1 = vmul.f32 %v310_v36, %v1837_v49  ;;  %v366_v2 = vmul.f32 %v1929_v6, %v1929_v6  ;;  %v315_v52 = vmul.f32 0.5, %v1907_v9 }
 0x17f   :  { %v433_v59 = vadd.f32 %v432_v57, %v406_v50  ;;  %v414_v11 = vmul.f32 0.6931472, %v1553_v60  ;;  %v311_v50 = vmul.f32 0.5, %v1844_v54  ;;  %v312_v57 = vmul.f32 0.5, %v1846_v55 }
 0x180   :  { %1562 = vlog2.f32 %v395_v42  ;;  %v382_v48 = vsub.f32 1.0, %v366_v2 }
 0x181   :  { %v434_v5 = vadd.f32 %v433_v59, %v408_v56  ;;  %v396_v59 = vadd.f32 1e-08, %v380_v53  ;;  %v327_v60 = vmul.f32 %v311_v50, %v1844_v54  ;;  %v328_v28 = vmul.f32 %v312_v57, %v1846_v55 }
 0x182   :  { %v314_v54 = vmul.f32 0.5, %v1901_v4  ;;  %v398_v8 = vadd.f32 1e-08, %v382_v48  ;;  %v331_v50 = vmul.f32 %v315_v52, %v1907_v9 }
 0x183   :  { %v435_v17 = vadd.f32 %v434_v5, %v410_v58  ;;  %v1555_v43 = vpop.eup %1554  ;;  %v381_v58 = vsub.f32 1.0, %v365_v45  ;;  %1564 = vlog2.f32 %v396_v59 }
 0x184   :  { %v1557_v56 = vpop.eup %1556  ;;  %v416_v5 = vmul.f32 0.6931472, %v1555_v43  ;;  %v330_v36 = vmul.f32 %v314_v54, %v1901_v4 }
 0x185   :  { %v436_v7 = vadd.f32 %v435_v17, %v412_v63  ;;  %v342_v63 = vadd.f32 %v326_v1, %v325_v51  ;;  %v1559_v17 = vpop.eup %1558 }
 0x186   :  { %v420_v31 = vmul.f32 0.6931472, %v1559_v17  ;;  %v1561_v33 = vpop.eup %1560 }
 0x187   :  { %v437_v24 = vadd.f32 %v436_v7, %v414_v11  ;;  %v418_v11 = vmul.f32 0.6931472, %v1557_v56  ;;  %v313_v7 = vmul.f32 0.5, %v1899_v3  ;;  %v343_v26 = vadd.f32 %v342_v63, %v327_v60 }
 0x188   :  { %v422_v41 = vmul.f32 0.6931472, %v1561_v33 }
 0x189   :  { %438 = vadd.xlane.f32.xlu0 %v437_v24  ;;  %v397_v24 = vadd.f32 1e-08, %v381_v58  ;;  %v440_v32 = vadd.f32 %v418_v11, %v416_v5  ;;  %v329_v39 = vmul.f32 %v313_v7, %v1899_v3  ;;  %v344_v40 = vadd.f32 %v343_v26, %v328_v28 }
 0x18a   :  { %v1563_v46 = vpop.eup %1562  ;;  %v316_v3 = vmul.f32 0.5, %v1909_v37 }
 0x18b   :  { %1566 = vlog2.f32 %v397_v24  ;;  %v441_v44 = vadd.f32 %v440_v32, %v420_v31  ;;  %v345_v45 = vadd.f32 %v344_v40, %v329_v39  ;;  %v424_v53 = vmul.f32 0.6931472, %v1563_v46 }
 0x18c   :  { %v332_v58 = vmul.f32 %v316_v3, %v1909_v37  ;;  %v1728_v32 = vmov 0.0  }
 0x18d   :  { %v442_v42 = vadd.f32 %v441_v44, %v422_v41  ;;  %v1565_v43 = vpop.eup %1564  ;;  %v346_v51 = vadd.f32 %v345_v45, %v330_v36  ;;  %v1262_v33 = vsel %vm295_vm0, 1.0, %v1728_v32  ;;  %v1333_v32 = vpack.c.bf16 %v1869_v18, %v1881_v29 }
 0x18e   :  { %v426_v1 = vmul.f32 0.6931472, %v1565_v43 }
 0x18f   :  { %v443_v56 = vadd.f32 %v442_v42, %v424_v53  ;;  %v347_v59 = vadd.f32 %v346_v51, %v331_v50  ;;  %285 = vst [vmem:[#allocation10 + $0x28] sm:$0xff] %v1333_v32 }
 0x191   :  { %v444_v4 = vadd.f32 %v443_v56, %v426_v1  ;;  %v348_v11 = vadd.f32 %v347_v59, %v332_v58 }
 0x195   :  { %v1567_v57 = vpop.eup %1566 }
 0x196   :  { %v428_v60 = vmul.f32 0.6931472, %v1567_v57 }
 0x198   :  { %v445_v7 = vadd.f32 %v444_v4, %v428_v60 }
 0x1f8   :  { %v1162_v49 = vpop.xlane.xlu0 %1161 }
 0x1f9   :  { %v1165_v34 = vsub.f32 %v1948_v21, %v1162_v49 }
 0x1fb   :  { %v1167_v35 = vmul.f32 1.442695, %v1165_v34 }
 0x1fc   :  { %v1164_v38 = vpop.xlane.xlu0 %1163 }
 0x1fd   :  { %v1166_v55 = vsub.f32 %v1950_v30, %v1164_v38  ;;  %1568 = vpow2.f32 %v1167_v35 }
 0x1fe   :  { %1570 = vlog2.f32 %v398_v8 }
 0x1ff   :  { %v1169_v47 = vmul.f32 1.442695, %v1166_v55 }
 0x201   :  { %1572 = vpow2.f32 %v1169_v47 }
 0x202   :  { %v341_v44 = vpop.xlane.xlu0 %340 }
 0x207   :  { %v1569_v2 = vpop.eup %1568 }
 0x208   :  { %1171 = vadd.xlane.f32.xlu1 %v1569_v2  ;;  %v1571_v63 = vpop.eup %1570 }
 0x209   :  { %v430_v17 = vmul.f32 0.6931472, %v1571_v63 }
 0x20b   :  { %v1573_v5 = vpop.eup %1572  ;;  %v446_v48 = vadd.f32 %v445_v7, %v430_v17 }
 0x20c   :  { %1173 = vadd.xlane.f32.xlu1 %v1573_v5 }
 0x210   :  { %349 = vadd.xlane.f32.xlu1 %v348_v11 }
 0x214   :  { %447 = vadd.xlane.f32.xlu1 %v446_v48 }
 0x216   :  { %v439_v55 = vpop.xlane.xlu0 %438 }
 0x295   :  { %v1172_v9 = vpop.xlane.xlu1 %1171 }
 0x296   :  { %1574 = vlog2.f32 %v1172_v9 }
 0x299   :  { %v1174_v24 = vpop.xlane.xlu1 %1173 }
 0x29a   :  { %1576 = vlog2.f32 %v1174_v24  ;;  %v1328_v24 = vpack.c.bf16 %v1861_v14, %v1871_v19  ;;  %v1335_v14 = vpack.c.bf16 %v1929_v6, %v1941_v20 }
 0x29c   :  { %280 = vst [vmem:[#allocation10] sm:$0xff] %v1328_v24  ;;  %287 = vst [vmem:[#allocation10 + $0x38] sm:$0xff] %v1335_v14 }
 0x29d   :  { %v350_v41 = vpop.xlane.xlu1 %349 }
 0x29e   :  { %v450_v53 = vmul.f32 0.0, %v350_v41 }
 0x2a0   :  { %v1575_v28 = vpop.eup %1574  ;;  %v453_v42 = vsel %vm451_vm1, %v450_v53, 0.0 }
 0x2a1   :  { %v1176_v26 = vmul.f32 0.6931472, %v1575_v28  ;;  %v448_v46 = vpop.xlane.xlu1 %447  ;;  %v1329_v28 = vpack.c.bf16 %v1865_v16, %v1877_v25 }
 0x2a2   :  { %v465_v47 = vmul.f32 0.0, %v448_v46 }
 0x2a3   :  { %v1179_v37 = vadd.f32 %v1176_v26, %v1162_v49  ;;  %v464_v49 = vmul.f32 %v1262_v33, %v439_v55  ;;  %v1330_v26 = vpack.c.bf16 %v1921_v61, %v1931_v10  ;;  %281 = vst [vmem:[#allocation10 + $0x8] sm:$0xff] %v1329_v28 }
 0x2a4   :  { %v1577_v31 = vpop.eup %1576  ;;  %v467_v36 = vsel %vm451_vm1, %v465_v47, 0.0 }
 0x2a5   :  { %v1178_v34 = vmul.f32 0.6931472, %v1577_v31  ;;  %v1181_v35 = vsub.f32 %v1179_v37, %v1948_v21  ;;  %v466_v52 = vsel %vm451_vm1, %v464_v49, 0.0  ;;  %v449_v21 = vmul.f32 %v1262_v33, %v341_v44  ;;  %282 = vst [vmem:[#allocation10 + $0x10] sm:$0xff] %v1330_v26 }
 0x2a6   :  { %v468_v45 = vadd.f32 %v467_v36, %v466_v52  ;;  %v1331_v37 = vpack.c.bf16 %v1925_v0, %v1937_v13  ;;  %v1332_v31 = vpack.c.bf16 %v1863_v15, %v1875_v23 }
 0x2a7   :  { %v1180_v54 = vadd.f32 %v1178_v34, %v1164_v38  ;;  %v1183_v8 = vmul.f32 %v1262_v33, %v1181_v35  ;;  %v452_v38 = vsel %vm451_vm1, %v449_v21, 0.0  ;;  %v1334_v33 = vpack.c.bf16 %v1923_v62, %v1935_v12 }
 0x2a8   :  { %v454_v43 = vadd.f32 %v453_v42, %v452_v38  ;;  %283 = vst [vmem:[#allocation10 + $0x18] sm:$0xff] %v1331_v37  ;;  %284 = vst [vmem:[#allocation10 + $0x20] sm:$0xff] %v1332_v31 }
 0x2a9   :  { %1187 = vrot.lane.b32.xlu0 %v1183_v8, %s1729_s3  ;;  %v1182_v39 = vsub.f32 %v1180_v54, %v1950_v30  ;;  %286 = vst [vmem:[#allocation10 + $0x30] sm:$0xff] %v1334_v33 }
 0x2ab   :  { %v1184_v40 = vmul.f32 0.0, %v1182_v39 }
 0x2ad   :  { %1189 = vrot.lane.b32.xlu1 %v1184_v40, %s1729_s3 }
 0x2c8   :  { %469 = vadd.xlane.f32.xlu0 %v468_v45 }
 0x2d1   :  { %455 = vadd.xlane.f32.xlu1 %v454_v43 }
 0x31b   :  { %v1188_v30 = vpop.permute.xlu0 %1187 }
 0x31c   :  { %v1193_v50 = vsel %vm451_vm1, %v1188_v30, 0.0 }
 0x31f   :  { %v1190_v3 = vpop.permute.xlu1 %1189 }
 0x320   :  { %v1194_v51 = vsel %vm451_vm1, %v1190_v3, 0.0 }
 0x321   :  { %v1195_v1 = vadd.f32 %v1194_v51, %v1193_v50 }
 0x323   :  { %1196 = vadd.xlane.f32.xlu0 %v1195_v1 }
 0x355   :  { %v470_v56 = vpop.xlane.xlu0 %469 }
 0x356   :  { %v471_v57 = vrot.slane %v470_v56, 4 }
 0x358   :  { %v472_v2 = vadd.f32 %v471_v57, %v470_v56 }
 0x35a   :  { %v473_v58 = vrot.slane %v472_v2, 2 }
 0x35c   :  { %v474_v4 = vadd.f32 %v473_v58, %v472_v2 }
 0x35e   :  { %v456_v59 = vpop.xlane.xlu1 %455  ;;  %v475_v11 = vrot.slane %v474_v4, 1 }
 0x35f   :  { %v457_v60 = vrot.slane %v456_v59, 4 }
 0x360   :  { %v476_v48 = vadd.f32 %v475_v11, %v474_v4 }
 0x361   :  { %v458_v63 = vadd.f32 %v457_v60, %v456_v59 }
 0x363   :  { %v459_v5 = vrot.slane %v458_v63, 2 }
 0x365   :  { %v460_v17 = vadd.f32 %v459_v5, %v458_v63 }
 0x367   :  { %v461_v7 = vrot.slane %v460_v17, 1 }
 0x369   :  { %v462_v9 = vadd.f32 %v461_v7, %v460_v17 }
 0x36b   :  { %1424 = vpush %v462_v9 }
 0x36c   :  { %1426 = vpush %v476_v48 }
 0x36d   :  { %1677 = shalt.err (!%p1674_p8)
}
 0x36e   :  { %s1678_s28 = scalar_lea.hbm %s2073_s5, 1024 }
 0x36f   :  { %p1679_p9 = scmp.ne.s32.totalorder %s2073_s5, %s1678_s28  ;;  %p1682_p10 = scmp.lt.u32.totalorder %s1678_s28, %s2073_s5 }
 0x371   :  { %p1684_p11 = pnand %p1682_p10, %p1679_p9 }
 0x373   :  { %1687 = shalt.err (!%p1684_p11)
}
 0x374   :  { %1232 = dma.vmem_to_hbm [thread:$0]  %s1227_s23, 1024, %s2073_s5, [#allocation4], %s1726_s2, %s1726_s2, %s1727_s1   ;;  %v1206_v61 = vand.u32 127, %v103_v22  ;;  %vm1207_vm2 = vcmp.eq.s32.totalorder %v1819_v27, 0 }
 0x375   :  { %s1731_s5 = smov [#allocation11]  }
 0x376   :  { %vm1212_vm3 = vcmp.eq.s32.totalorder %v1206_v61, 2  ;;  %vm1210_vm4 = vcmp.eq.s32.totalorder %v1206_v61, 1  ;;  %vm1208_vm5 = vcmp.eq.s32.totalorder %v1206_v61, 0  ;;  %s1239_s12 = sshll.u32 %s1731_s5, 4  ;;  %s1240_s12 = int_to_ptr.vmem [resolvable:$true] %s1239_s12 }
 0x377   :  { %vm1213_vm6 = vmand %vm1207_vm2, %vm1212_vm3  ;;  %s1688_s13 = scalar_lea.vmem %s1240_s12, 128  ;;  %p1693_p13 = scmp.lt.s32.totalorder %s1240_s12, %s1240_s12 }
 0x378   :  { %vm1211_vm7 = vmand %vm1207_vm2, %vm1210_vm4  ;;  %p1689_p12 = scmp.ne.s32.totalorder %s1240_s12, %s1688_s13  ;;  %p1694_p0 = scmp.lt.s32.totalorder %s1688_s13, %s1688_s13 }
 0x379   :  { %vm1209_vm8 = vmand %vm1207_vm2, %vm1208_vm5 }
 0x37a   :  { %p1695_p1 = por %p1694_p0, %p1693_p13 }
 0x37c   :  { %p1696_p2 = pnand %p1695_p1, %p1689_p12 }
 0x39c   :  { %s1425_s9 = spop %1424 }
 0x39d   :  { %s1427_s10 = spop %1426  ;;  %v1218_v10 = vstv %s1425_s9 }
 0x39e   :  { %v1216_v0 = vstv %s1427_s10 }
 0x3b0   :  { %v1197_v15 = vpop.xlane.xlu0 %1196 }
 0x3b1   :  { %v1198_v16 = vrot.slane %v1197_v15, 4 }
 0x3b3   :  { %v1199_v18 = vadd.f32 %v1198_v16, %v1197_v15 }
 0x3b5   :  { %v1200_v19 = vrot.slane %v1199_v18, 2 }
 0x3b7   :  { %v1201_v23 = vadd.f32 %v1200_v19, %v1199_v18 }
 0x3b9   :  { %v1202_v25 = vrot.slane %v1201_v23, 1 }
 0x3bb   :  { %v1203_v29 = vadd.f32 %v1202_v25, %v1201_v23 }
 0x3bd   :  { %1428 = vpush %v1203_v29 }
 0x3ee   :  { %s1429_s11 = spop %1428 }
 0x3ef   :  { %v1214_v62 = vstv %s1429_s11 }
 0x3f0   :  { %v1215_v6 = vsel %vm1213_vm6, %v1214_v62, 0.0 }
 0x3f1   :  { %v1217_v12 = vsel %vm1211_vm7, %v1216_v0, %v1215_v6 }
 0x3f2   :  { %v1219_v22 = vsel %vm1209_vm8, %v1218_v10, %v1217_v12 }
 0x3f3   :  { %1220 = vst [vmem:[#allocation11] sm:$0xff] %v1219_v22 }
 0x3f4   :  { %1699 = shalt.err (!%p1696_p2)
}
 0x3f5   :  { %s1700_s16 = scalar_lea.hbm %s2074_s6, 128 }
 0x3f6   :  { %p1701_p3 = scmp.ne.s32.totalorder %s2074_s6, %s1700_s16  ;;  %p1704_p4 = scmp.lt.u32.totalorder %s1700_s16, %s2074_s6 }
 0x3f8   :  { %p1706_p5 = pnand %p1704_p4, %p1701_p3 }
 0x3fa   :  { %1709 = shalt.err (!%p1706_p5)
}
 0x3fb   :  { %1242 = dma.vmem_to_hbm [thread:$0]  %s1240_s12, 128, %s2074_s6, [#allocation12]  }
 0x3fc   :  { %1716 = dma.done.wait [#allocation4], 1024  }
 0x3fd   :  { %1717 = vsyncadd [#allocation4], 4294966272 }
 0x3fe   :  { %1718 = dma.done.wait [#allocation12], 128  }
 0x3ff   :  { %1719 = vsyncadd [#allocation12], 4294967168 }
 0x400   :  { %1249 = vsyncpa [#allocation3], 1 }
 0x401   :  { %1250 = vsyncpa [#allocation6], 1 }
 0x402   :  { %1251 = vsyncpa [#allocation9], 1 }
 0x403   :  { %1252 = vsyncpa [#allocation4], 1 }
 0x404   :  { %1253 = vsyncpa [#allocation12], 1 }

</bundles_post_ra>
